<compile_context>
chip_gen: v7x
topology: tpu7x:2x2x1
jax: 0.10.0
libtpu: 0.0.40
codegen_flags: <defaults>
</compile_context>

<pallas_src>
import functools
import math

import jax
import jax.numpy as jnp
from jax.experimental import pallas as pl
from jax.experimental.pallas import tpu as pltpu

K = 7     # conv kernel size
PAD = 3   # conv padding


def _round_up(v, m):
    return ((v + m - 1) // m) * m


def get_important_channel_num(C, lam=0.6):
    t = lam * C
    fl = math.floor(t)
    return fl + fl % 2


def _conv_col_masks(W, HW):
    """(K, HW) 0/1 masks: tap column kw is valid where col(p)+kw-3 stays inside the row."""
    col = jnp.arange(HW, dtype=jnp.int32) % W
    rows = []
    for kw in range(K):
        d = kw - PAD
        rows.append((col + d >= 0) & (col + d < W))
    return jnp.stack(rows, axis=0).astype(jnp.float32)


def _spatial_attention_kernel(x_ref, immask_ref, cmask_ref, wrow_ref, bn_ref,
                              o_ref, pad_in_ref, pad_p_ref, *,
                              inv_im, inv_sub, W, G):
    TB, C, HW = x_ref.shape
    R = pad_in_ref.shape[0]            # 4 * TB   (avg rows then max rows)
    HWpad = pad_in_ref.shape[1]        # HW + 2*G
    half = R // 2                      # 2 * TB

    # --- zero the guard zones on EVERY step (safe under 'parallel'/megacore) ---
    pad_in_ref[:, 0:G] = jnp.zeros((R, G), jnp.float32)
    pad_in_ref[:, G + HW:HWpad] = jnp.zeros((R, G), jnp.float32)
    pad_p_ref[:, :, 0:G] = jnp.zeros((K, R, G), jnp.float32)
    pad_p_ref[:, :, G + HW:HWpad] = jnp.zeros((K, R, G), jnp.float32)

    x = x_ref[...].astype(jnp.float32)               # (TB, C, HW) lane-dense
    mask_c = immask_ref[...].astype(jnp.float32)     # (TB, C, 1)  0/1 channel mask

    # --- masked channel pooling, f32 accumulation ------------------------------
    im_feat = x * mask_c                              # important features
    tot_sum = jnp.sum(x, axis=1)                      # (TB, HW)
    im_sum = jnp.sum(im_feat, axis=1)
    sub_sum = tot_sum - im_sum                        # saves one full reduction
    im_max = jnp.max(im_feat, axis=1)
    sub_max = jnp.max(x - im_feat, axis=1)

    # row layout: [im_avg(TB) | sub_avg(TB) | im_max(TB) | sub_max(TB)]
    pooled = jnp.concatenate(
        [im_sum * inv_im, sub_sum * inv_sub, im_max, sub_max], axis=0)   # (R, HW)
    pad_in_ref[:, G:G + HW] = pooled                  # lane-aligned interior store

    # --- separable 7x7 conv -----------------------------------------------------
    # column pass: 7 shifted slice loads + 7 column-validity mask multiplies
    scol = []
    for kw in range(K):
        d = kw - PAD
        sl = pad_in_ref[:, G + d:G + d + HW]          # (R, HW)
        scol.append(sl * cmask_ref[kw:kw + 1, :])

    # per-kh weighted partial sums; per-row weight vector applies the avg-channel
    # weight to the first 2*TB rows and the max-channel weight to the last 2*TB
    for kh in range(K):
        p4 = None
        for kw in range(K):
            term = wrow_ref[kh * K + kw] * scol[kw]   # (R,1) * (R,HW)
            p4 = term if p4 is None else p4 + term
        pad_p_ref[kh, :, G:G + HW] = p4

    # row pass: 7 row-shifted slice loads; the zero guard supplies the row padding
    acc4 = jnp.zeros((R, HW), jnp.float32)
    for kh in range(K):
        d = (kh - PAD) * W
        acc4 = acc4 + pad_p_ref[kh, :, G + d:G + d + HW]

    acc = acc4[:half, :] + acc4[half:, :]             # avg-ch + max-ch  -> (2*TB, HW)

    # --- BatchNorm2d(1) + ReLU + Sigmoid ----------------------------------------
    # TODO(synk): BatchNorm2d is applied with eval-mode running statistics
    # (gamma/beta/mean/var folded into bn_ref = [scale, shift]); training-mode
    # batch statistics are not replicated here.
    z = acc * bn_ref[0] + bn_ref[1]
    act = jax.nn.sigmoid(jnp.maximum(z, 0.0))         # rows [0:TB]=A_S1, [TB:2TB]=A_S2

    # --- recombination: out = x*A_S2 + im_feat*(A_S1 - A_S2) ---------------------
    for b in range(TB):
        a1 = act[b:b + 1, :]                          # (1, HW)
        a2 = act[TB + b:TB + b + 1, :]
        out_b = x[b] * a2 + im_feat[b] * (a1 - a2)    # (C, HW) f32
        o_ref[b, :, :] = out_b.astype(o_ref.dtype)


def spatial_attention(x, M, conv_w, bn_scale, bn_shift):
    """x: (B, C, H, W), M: (B, C, 1, 1) channel-attention map."""
    B, C, H, W = x.shape
    HW = H * W
    C_im = get_important_channel_num(C)
    C_subim = C - C_im
    inv_im = 1.0 / C_im
    # TODO(synk): torch divides by C_subim even when it is 0 (-> inf/nan); we guard to 0.
    inv_sub = (1.0 / C_subim) if C_subim > 0 else 0.0

    # --- glue (plain JAX): torch.topk + scatter -> 0/1 channel-selection mask ---
    # (tie-breaking may differ from torch.topk when attention values are equal)
    m = M.reshape(B, C)
    _, topk_idx = jax.lax.top_k(m, C_im)
    im_mask = jnp.zeros((B, C), jnp.float32).at[
        jnp.arange(B)[:, None], topk_idx].set(1.0)
    im_mask = im_mask.reshape(B, C, 1)

    x_flat = x.reshape(B, C, HW)                      # free reshape -> lane-dense

    # --- batch packing: TB batch elements per grid step --------------------------
    TB = min(4, B)
    while TB > 1 and 4 * TB * C * HW * x.dtype.itemsize > 24 * 1024 * 1024:
        TB //= 2
    B_pad = _round_up(B, TB)
    if B_pad != B:
        x_flat = jnp.pad(x_flat, ((0, B_pad - B), (0, 0), (0, 0)))
        im_mask = jnp.pad(im_mask, ((0, B_pad - B), (0, 0), (0, 0)))

    G = _round_up(3 * W, 128)                         # lane-aligned zero guard (>= 3*W)
    HWpad = HW + 2 * G

    cmask = _conv_col_masks(W, HW)                    # (K, HW) column-validity masks
    w_flat = conv_w.reshape(2, K * K).astype(jnp.float32)
    # per-row weight vectors: first 2*TB rows = avg conv channel, last 2*TB = max
    wrow = jnp.concatenate(
        [jnp.broadcast_to(w_flat[0][:, None], (K * K, 2 * TB)),
         jnp.broadcast_to(w_flat[1][:, None], (K * K, 2 * TB))],
        axis=1)[:, :, None]                           # (K*K, 4*TB, 1)
    bn = jnp.array([bn_scale, bn_shift], jnp.float32)

    kernel = functools.partial(_spatial_attention_kernel,
                               inv_im=inv_im, inv_sub=inv_sub, W=W, G=G)

    # VMEM budget: double-buffered in/out blocks + constants + conv scratches,
    # capped at 48 MiB so it is safe on v7x (64 MiB physical per TensorCore).
    block_bytes = TB * C * HW * x.dtype.itemsize
    scratch_bytes = (4 * TB * HWpad + K * 4 * TB * HWpad) * 4
    const_bytes = (K * HW + K * K * 4 * TB + TB * C) * 4
    vmem_need = 4 * block_bytes + scratch_bytes + 2 * const_bytes + (1 << 20)
    vmem_limit = int(min(max(2 * vmem_need, 8 * 1024 * 1024), 48 * 1024 * 1024))

    grid = (B_pad // TB,)
    out_flat = pl.pallas_call(
        kernel,
        out_shape=jax.ShapeDtypeStruct((B_pad, C, HW), x.dtype),
        grid=grid,
        in_specs=[
            pl.BlockSpec((TB, C, HW), lambda b: (b, 0, 0)),            # x (flat)
            pl.BlockSpec((TB, C, 1), lambda b: (b, 0, 0)),             # channel mask
            pl.BlockSpec((K, HW), lambda b: (0, 0)),                   # column masks
            pl.BlockSpec((K * K, 4 * TB, 1), lambda b: (0, 0, 0)),     # per-row conv weights
            pl.BlockSpec(memory_space=pltpu.MemorySpace.SMEM),         # bn scale/shift
        ],
        out_specs=pl.BlockSpec((TB, C, HW), lambda b: (b, 0, 0)),
        scratch_shapes=[
            pltpu.VMEM((4 * TB, HWpad), jnp.float32),                  # guarded pooled maps
            pltpu.VMEM((K, 4 * TB, HWpad), jnp.float32),               # guarded per-kh partials
        ],
        compiler_params=pltpu.CompilerParams(
            dimension_semantics=("parallel",),
            vmem_limit_bytes=vmem_limit,
        ),
    )(x_flat, im_mask, cmask, wrow, bn)

    return out_flat[:B].reshape(B, C, H, W)


def _reference(x, M, conv_w, bn_scale, bn_shift):
    """Pure-JAX reference mirroring the PyTorch forward (eval-mode BN)."""
    B, C, H, W = x.shape
    C_im = get_important_channel_num(C)
    C_subim = C - C_im
    m = M.reshape(B, C)
    _, idx = jax.lax.top_k(m, C_im)
    im = jnp.zeros((B, C), x.dtype).at[jnp.arange(B)[:, None], idx].set(1.0)
    im = im.reshape(B, C, 1, 1)
    sub = 1.0 - im
    imf, subf = im * x, sub * x
    im_avg = jnp.mean(imf, axis=1, keepdims=True) * (C / C_im)
    im_max = jnp.max(imf, axis=1, keepdims=True)
    s_avg = jnp.mean(subf, axis=1, keepdims=True) * (C / C_subim)
    s_max = jnp.max(subf, axis=1, keepdims=True)

    def conv_bn_act(a, mx):
        inp = jnp.concatenate([a, mx], axis=1)
        out = jax.lax.conv_general_dilated(
            inp, conv_w, window_strides=(1, 1), padding=[(PAD, PAD), (PAD, PAD)],
            dimension_numbers=("NCHW", "OIHW", "NCHW"))
        z = out * bn_scale + bn_shift
        return jax.nn.sigmoid(jnp.maximum(z, 0.0))

    a1 = conv_bn_act(im_avg, im_max)
    a2 = conv_bn_act(s_avg, s_max)
    return imf * a1 + subf * a2


if __name__ == "__main__":
    B, C, H, W = 2, 4, 16, 16

    key = jax.random.PRNGKey(0)
    k_w, k_x, k_m = jax.random.split(key, 3)

    # deterministic parameter init (shapes from __init__): Conv2d(2, 1, 7, bias=False)
    bound = 1.0 / math.sqrt(2 * K * K)
    conv_w = jax.random.uniform(k_w, (1, 2, K, K), jnp.float32, -bound, bound)

    # BatchNorm2d(1) defaults, folded to scale/shift (eval-mode running stats)
    eps = 1e-5
    gamma, beta, run_mean, run_var = 1.0, 0.0, 0.0, 1.0
    bn_scale = gamma / math.sqrt(run_var + eps)
    bn_shift = beta - run_mean * bn_scale

    x = jax.random.normal(k_x, (B, C, H, W), jnp.float32)
    M = jax.random.uniform(k_m, (B, C, 1, 1), jnp.float32)  # channel attention map

    out = spatial_attention(x, M, conv_w, bn_scale, bn_shift)
    out = jax.block_until_ready(out)

    ref = _reference(x, M, conv_w, bn_scale, bn_shift)
    if not jnp.allclose(out, ref, atol=1e-4, rtol=1e-4):
        raise AssertionError("Pallas kernel does not match JAX reference")

    print("KERNEL_OK")
</pallas_src>

<mosaic_0001>
module attributes {stable_mosaic.version = 11 : i64} {
  func.func @_spatial_attention_kernel(%arg0: i32, %arg1: memref<2x4x256xf32, #tpu.memory_space<vmem>>, %arg2: memref<2x4x1xf32, #tpu.memory_space<vmem>>, %arg3: memref<7x256xf32, #tpu.memory_space<vmem>>, %arg4: memref<49x8x1xf32, #tpu.memory_space<vmem>>, %arg5: memref<2xf32, #tpu.memory_space<smem>>, %arg6: memref<2x4x256xf32, #tpu.memory_space<vmem>>, %arg7: memref<8x512xf32, #tpu.memory_space<vmem>>, %arg8: memref<7x8x512xf32, #tpu.memory_space<vmem>>) attributes {dimension_semantics = [#tpu.dimension_semantics<parallel>], iteration_bounds = array<i64: 1>, scalar_prefetch = 0 : i64, scratch_operands = 2 : i64, tpu.core_type = #tpu.core_type<tc>, window_params = [{transform_indices = @transform_0, window_bounds = array<i64: 2, 4, 256>}, {transform_indices = @transform_1, window_bounds = array<i64: 2, 4, 1>}, {pipeline_mode = #tpu.pipeline_mode<synchronous>, transform_indices = @transform_2, window_bounds = array<i64: 7, 256>}, {pipeline_mode = #tpu.pipeline_mode<synchronous>, transform_indices = @transform_3, window_bounds = array<i64: 49, 8, 1>}, {transform_indices = @transform_4, window_bounds = array<i64: 2>}, {transform_indices = @transform_5, window_bounds = array<i64: 2, 4, 256>}]} {
    %cst = arith.constant 0.000000e+00 : f32
    %0 = vector.broadcast %cst : f32 to vector<8x128xf32>
    %c0 = arith.constant 0 : index
    %c0_0 = arith.constant 0 : index
    %1 = vector.load %arg7[%c0, %c0_0] : memref<8x512xf32, #tpu.memory_space<vmem>>, vector<8x128xf32>
    tpu.vector_store %arg7[%c0, %c0_0], %0 {strides = array<i32>} : memref<8x512xf32, #tpu.memory_space<vmem>>, vector<8x128xf32>,
    %cst_1 = arith.constant 0.000000e+00 : f32
    %2 = vector.broadcast %cst_1 : f32 to vector<8x128xf32>
    %c0_2 = arith.constant 0 : index
    %c384 = arith.constant 384 : index
    %3 = vector.load %arg7[%c0_2, %c384] : memref<8x512xf32, #tpu.memory_space<vmem>>, vector<8x128xf32>
    tpu.vector_store %arg7[%c0_2, %c384], %2 {strides = array<i32>} : memref<8x512xf32, #tpu.memory_space<vmem>>, vector<8x128xf32>,
    %cst_3 = arith.constant 0.000000e+00 : f32
    %4 = vector.broadcast %cst_3 : f32 to vector<7x8x128xf32>
    %c0_4 = arith.constant 0 : index
    %c0_5 = arith.constant 0 : index
    %c0_6 = arith.constant 0 : index
    %5 = vector.load %arg8[%c0_4, %c0_5, %c0_6] : memref<7x8x512xf32, #tpu.memory_space<vmem>>, vector<7x8x128xf32>
    tpu.vector_store %arg8[%c0_4, %c0_5, %c0_6], %4 {strides = array<i32>} : memref<7x8x512xf32, #tpu.memory_space<vmem>>, vector<7x8x128xf32>,
    %cst_7 = arith.constant 0.000000e+00 : f32
    %6 = vector.broadcast %cst_7 : f32 to vector<7x8x128xf32>
    %c0_8 = arith.constant 0 : index
    %c0_9 = arith.constant 0 : index
    %c384_10 = arith.constant 384 : index
    %7 = vector.load %arg8[%c0_8, %c0_9, %c384_10] : memref<7x8x512xf32, #tpu.memory_space<vmem>>, vector<7x8x128xf32>
    tpu.vector_store %arg8[%c0_8, %c0_9, %c384_10], %6 {strides = array<i32>} : memref<7x8x512xf32, #tpu.memory_space<vmem>>, vector<7x8x128xf32>,
    %c0_11 = arith.constant 0 : index
    %c0_12 = arith.constant 0 : index
    %c0_13 = arith.constant 0 : index
    %8 = vector.load %arg1[%c0_11, %c0_12, %c0_13] : memref<2x4x256xf32, #tpu.memory_space<vmem>>, vector<2x4x256xf32>
    %c0_14 = arith.constant 0 : index
    %c0_15 = arith.constant 0 : index
    %c0_16 = arith.constant 0 : index
    %9 = vector.load %arg2[%c0_14, %c0_15, %c0_16] : memref<2x4x1xf32, #tpu.memory_space<vmem>>, vector<2x4x1xf32>
    %10 = vector.broadcast %9 : vector<2x4x1xf32> to vector<2x4x256xf32>
    %11 = arith.mulf %8, %10 : vector<2x4x256xf32>
    %cst_17 = arith.constant dense<0.000000e+00> : vector<2x256xf32>
    %12 = vector.multi_reduction <add>, %8, %cst_17 [1] : vector<2x4x256xf32> to vector<2x256xf32>
    %cst_18 = arith.constant dense<0.000000e+00> : vector<2x256xf32>
    %13 = vector.multi_reduction <add>, %11, %cst_18 [1] : vector<2x4x256xf32> to vector<2x256xf32>
    %14 = arith.subf %12, %13 : vector<2x256xf32>
    %cst_19 = arith.constant dense<0xFF800000> : vector<2x256xf32>
    %15 = vector.multi_reduction <maximumf>, %11, %cst_19 [1] : vector<2x4x256xf32> to vector<2x256xf32>
    %16 = arith.subf %8, %11 : vector<2x4x256xf32>
    %cst_20 = arith.constant dense<0xFF800000> : vector<2x256xf32>
    %17 = vector.multi_reduction <maximumf>, %16, %cst_20 [1] : vector<2x4x256xf32> to vector<2x256xf32>
    %cst_21 = arith.constant 5.000000e-01 : f32
    %18 = vector.broadcast %cst_21 : f32 to vector<2x256xf32>
    %19 = arith.mulf %13, %18 : vector<2x256xf32>
    %cst_22 = arith.constant 5.000000e-01 : f32
    %20 = vector.broadcast %cst_22 : f32 to vector<2x256xf32>
    %21 = arith.mulf %14, %20 : vector<2x256xf32>
    %22 = tpu.concatenate %19, %21, %15, %17 in 0 : vector<2x256xf32>, vector<2x256xf32>, vector<2x256xf32>, vector<2x256xf32> -> vector<8x256xf32>
    %c0_23 = arith.constant 0 : index
    %c128 = arith.constant 128 : index
    %23 = vector.load %arg7[%c0_23, %c128] : memref<8x512xf32, #tpu.memory_space<vmem>>, vector<8x256xf32>
    tpu.vector_store %arg7[%c0_23, %c128], %22 {strides = array<i32>} : memref<8x512xf32, #tpu.memory_space<vmem>>, vector<8x256xf32>,
    %c0_24 = arith.constant 0 : index
    %c125 = arith.constant 125 : index
    %24 = vector.load %arg7[%c0_24, %c125] : memref<8x512xf32, #tpu.memory_space<vmem>>, vector<8x256xf32>
    %c0_25 = arith.constant 0 : index
    %c0_26 = arith.constant 0 : index
    %25 = vector.load %arg3[%c0_25, %c0_26] : memref<7x256xf32, #tpu.memory_space<vmem>>, vector<1x256xf32>
    %26 = vector.broadcast %25 : vector<1x256xf32> to vector<8x256xf32>
    %27 = arith.mulf %24, %26 : vector<8x256xf32>
    %c0_27 = arith.constant 0 : index
    %c126 = arith.constant 126 : index
    %28 = vector.load %arg7[%c0_27, %c126] : memref<8x512xf32, #tpu.memory_space<vmem>>, vector<8x256xf32>
    %c1 = arith.constant 1 : index
    %c0_28 = arith.constant 0 : index
    %29 = vector.load %arg3[%c1, %c0_28] : memref<7x256xf32, #tpu.memory_space<vmem>>, vector<1x256xf32>
    %30 = vector.broadcast %29 : vector<1x256xf32> to vector<8x256xf32>
    %31 = arith.mulf %28, %30 : vector<8x256xf32>
    %c0_29 = arith.constant 0 : index
    %c127 = arith.constant 127 : index
    %32 = vector.load %arg7[%c0_29, %c127] : memref<8x512xf32, #tpu.memory_space<vmem>>, vector<8x256xf32>
    %c2 = arith.constant 2 : index
    %c0_30 = arith.constant 0 : index
    %33 = vector.load %arg3[%c2, %c0_30] : memref<7x256xf32, #tpu.memory_space<vmem>>, vector<1x256xf32>
    %34 = vector.broadcast %33 : vector<1x256xf32> to vector<8x256xf32>
    %35 = arith.mulf %32, %34 : vector<8x256xf32>
    %c0_31 = arith.constant 0 : index
    %c128_32 = arith.constant 128 : index
    %36 = vector.load %arg7[%c0_31, %c128_32] : memref<8x512xf32, #tpu.memory_space<vmem>>, vector<8x256xf32>
    %c3 = arith.constant 3 : index
    %c0_33 = arith.constant 0 : index
    %37 = vector.load %arg3[%c3, %c0_33] : memref<7x256xf32, #tpu.memory_space<vmem>>, vector<1x256xf32>
    %38 = vector.broadcast %37 : vector<1x256xf32> to vector<8x256xf32>
    %39 = arith.mulf %36, %38 : vector<8x256xf32>
    %c0_34 = arith.constant 0 : index
    %c129 = arith.constant 129 : index
    %40 = vector.load %arg7[%c0_34, %c129] : memref<8x512xf32, #tpu.memory_space<vmem>>, vector<8x256xf32>
    %c4 = arith.constant 4 : index
    %c0_35 = arith.constant 0 : index
    %41 = vector.load %arg3[%c4, %c0_35] : memref<7x256xf32, #tpu.memory_space<vmem>>, vector<1x256xf32>
    %42 = vector.broadcast %41 : vector<1x256xf32> to vector<8x256xf32>
    %43 = arith.mulf %40, %42 : vector<8x256xf32>
    %c0_36 = arith.constant 0 : index
    %c130 = arith.constant 130 : index
    %44 = vector.load %arg7[%c0_36, %c130] : memref<8x512xf32, #tpu.memory_space<vmem>>, vector<8x256xf32>
    %c5 = arith.constant 5 : index
    %c0_37 = arith.constant 0 : index
    %45 = vector.load %arg3[%c5, %c0_37] : memref<7x256xf32, #tpu.memory_space<vmem>>, vector<1x256xf32>
    %46 = vector.broadcast %45 : vector<1x256xf32> to vector<8x256xf32>
    %47 = arith.mulf %44, %46 : vector<8x256xf32>
    %c0_38 = arith.constant 0 : index
    %c131 = arith.constant 131 : index
    %48 = vector.load %arg7[%c0_38, %c131] : memref<8x512xf32, #tpu.memory_space<vmem>>, vector<8x256xf32>
    %c6 = arith.constant 6 : index
    %c0_39 = arith.constant 0 : index
    %49 = vector.load %arg3[%c6, %c0_39] : memref<7x256xf32, #tpu.memory_space<vmem>>, vector<1x256xf32>
    %50 = vector.broadcast %49 : vector<1x256xf32> to vector<8x256xf32>
    %51 = arith.mulf %48, %50 : vector<8x256xf32>
    %c0_40 = arith.constant 0 : index
    %c0_41 = arith.constant 0 : index
    %c0_42 = arith.constant 0 : index
    %52 = vector.load %arg4[%c0_40, %c0_41, %c0_42] : memref<49x8x1xf32, #tpu.memory_space<vmem>>, vector<1x8x1xf32>
    %53 = vector.shape_cast %52 : vector<1x8x1xf32> to vector<8x1xf32>
    %54 = vector.broadcast %53 : vector<8x1xf32> to vector<8x256xf32>
    %55 = arith.mulf %54, %27 : vector<8x256xf32>
    %c1_43 = arith.constant 1 : index
    %c0_44 = arith.constant 0 : index
    %c0_45 = arith.constant 0 : index
    %56 = vector.load %arg4[%c1_43, %c0_44, %c0_45] : memref<49x8x1xf32, #tpu.memory_space<vmem>>, vector<1x8x1xf32>
    %57 = vector.shape_cast %56 : vector<1x8x1xf32> to vector<8x1xf32>
    %58 = vector.broadcast %57 : vector<8x1xf32> to vector<8x256xf32>
    %59 = arith.mulf %58, %31 : vector<8x256xf32>
    %60 = arith.addf %55, %59 : vector<8x256xf32>
    %c2_46 = arith.constant 2 : index
    %c0_47 = arith.constant 0 : index
    %c0_48 = arith.constant 0 : index
    %61 = vector.load %arg4[%c2_46, %c0_47, %c0_48] : memref<49x8x1xf32, #tpu.memory_space<vmem>>, vector<1x8x1xf32>
    %62 = vector.shape_cast %61 : vector<1x8x1xf32> to vector<8x1xf32>
    %63 = vector.broadcast %62 : vector<8x1xf32> to vector<8x256xf32>
    %64 = arith.mulf %63, %35 : vector<8x256xf32>
    %65 = arith.addf %60, %64 : vector<8x256xf32>
    %c3_49 = arith.constant 3 : index
    %c0_50 = arith.constant 0 : index
    %c0_51 = arith.constant 0 : index
    %66 = vector.load %arg4[%c3_49, %c0_50, %c0_51] : memref<49x8x1xf32, #tpu.memory_space<vmem>>, vector<1x8x1xf32>
    %67 = vector.shape_cast %66 : vector<1x8x1xf32> to vector<8x1xf32>
    %68 = vector.broadcast %67 : vector<8x1xf32> to vector<8x256xf32>
    %69 = arith.mulf %68, %39 : vector<8x256xf32>
    %70 = arith.addf %65, %69 : vector<8x256xf32>
    %c4_52 = arith.constant 4 : index
    %c0_53 = arith.constant 0 : index
    %c0_54 = arith.constant 0 : index
    %71 = vector.load %arg4[%c4_52, %c0_53, %c0_54] : memref<49x8x1xf32, #tpu.memory_space<vmem>>, vector<1x8x1xf32>
    %72 = vector.shape_cast %71 : vector<1x8x1xf32> to vector<8x1xf32>
    %73 = vector.broadcast %72 : vector<8x1xf32> to vector<8x256xf32>
    %74 = arith.mulf %73, %43 : vector<8x256xf32>
    %75 = arith.addf %70, %74 : vector<8x256xf32>
    %c5_55 = arith.constant 5 : index
    %c0_56 = arith.constant 0 : index
    %c0_57 = arith.constant 0 : index
    %76 = vector.load %arg4[%c5_55, %c0_56, %c0_57] : memref<49x8x1xf32, #tpu.memory_space<vmem>>, vector<1x8x1xf32>
    %77 = vector.shape_cast %76 : vector<1x8x1xf32> to vector<8x1xf32>
    %78 = vector.broadcast %77 : vector<8x1xf32> to vector<8x256xf32>
    %79 = arith.mulf %78, %47 : vector<8x256xf32>
    %80 = arith.addf %75, %79 : vector<8x256xf32>
    %c6_58 = arith.constant 6 : index
    %c0_59 = arith.constant 0 : index
    %c0_60 = arith.constant 0 : index
    %81 = vector.load %arg4[%c6_58, %c0_59, %c0_60] : memref<49x8x1xf32, #tpu.memory_space<vmem>>, vector<1x8x1xf32>
    %82 = vector.shape_cast %81 : vector<1x8x1xf32> to vector<8x1xf32>
    %83 = vector.broadcast %82 : vector<8x1xf32> to vector<8x256xf32>
    %84 = arith.mulf %83, %51 : vector<8x256xf32>
    %85 = arith.addf %80, %84 : vector<8x256xf32>
    %c0_61 = arith.constant 0 : index
    %c0_62 = arith.constant 0 : index
    %c128_63 = arith.constant 128 : index
    %86 = vector.load %arg8[%c0_61, %c0_62, %c128_63] : memref<7x8x512xf32, #tpu.memory_space<vmem>>, vector<1x8x256xf32>
    %87 = vector.shape_cast %86 : vector<1x8x256xf32> to vector<8x256xf32>
    %88 = vector.shape_cast %85 : vector<8x256xf32> to vector<1x8x256xf32>
    tpu.vector_store %arg8[%c0_61, %c0_62, %c128_63], %88 {strides = array<i32>} : memref<7x8x512xf32, #tpu.memory_space<vmem>>, vector<1x8x256xf32>,
    %c7 = arith.constant 7 : index
    %c0_64 = arith.constant 0 : index
    %c0_65 = arith.constant 0 : index
    %89 = vector.load %arg4[%c7, %c0_64, %c0_65] : memref<49x8x1xf32, #tpu.memory_space<vmem>>, vector<1x8x1xf32>
    %90 = vector.shape_cast %89 : vector<1x8x1xf32> to vector<8x1xf32>
    %91 = vector.broadcast %90 : vector<8x1xf32> to vector<8x256xf32>
    %92 = arith.mulf %91, %27 : vector<8x256xf32>
    %c8 = arith.constant 8 : index
    %c0_66 = arith.constant 0 : index
    %c0_67 = arith.constant 0 : index
    %93 = vector.load %arg4[%c8, %c0_66, %c0_67] : memref<49x8x1xf32, #tpu.memory_space<vmem>>, vector<1x8x1xf32>
    %94 = vector.shape_cast %93 : vector<1x8x1xf32> to vector<8x1xf32>
    %95 = vector.broadcast %94 : vector<8x1xf32> to vector<8x256xf32>
    %96 = arith.mulf %95, %31 : vector<8x256xf32>
    %97 = arith.addf %92, %96 : vector<8x256xf32>
    %c9 = arith.constant 9 : index
    %c0_68 = arith.constant 0 : index
    %c0_69 = arith.constant 0 : index
    %98 = vector.load %arg4[%c9, %c0_68, %c0_69] : memref<49x8x1xf32, #tpu.memory_space<vmem>>, vector<1x8x1xf32>
    %99 = vector.shape_cast %98 : vector<1x8x1xf32> to vector<8x1xf32>
    %100 = vector.broadcast %99 : vector<8x1xf32> to vector<8x256xf32>
    %101 = arith.mulf %100, %35 : vector<8x256xf32>
    %102 = arith.addf %97, %101 : vector<8x256xf32>
    %c10 = arith.constant 10 : index
    %c0_70 = arith.constant 0 : index
    %c0_71 = arith.constant 0 : index
    %103 = vector.load %arg4[%c10, %c0_70, %c0_71] : memref<49x8x1xf32, #tpu.memory_space<vmem>>, vector<1x8x1xf32>
    %104 = vector.shape_cast %103 : vector<1x8x1xf32> to vector<8x1xf32>
    %105 = vector.broadcast %104 : vector<8x1xf32> to vector<8x256xf32>
    %106 = arith.mulf %105, %39 : vector<8x256xf32>
    %107 = arith.addf %102, %106 : vector<8x256xf32>
    %c11 = arith.constant 11 : index
    %c0_72 = arith.constant 0 : index
    %c0_73 = arith.constant 0 : index
    %108 = vector.load %arg4[%c11, %c0_72, %c0_73] : memref<49x8x1xf32, #tpu.memory_space<vmem>>, vector<1x8x1xf32>
    %109 = vector.shape_cast %108 : vector<1x8x1xf32> to vector<8x1xf32>
    %110 = vector.broadcast %109 : vector<8x1xf32> to vector<8x256xf32>
    %111 = arith.mulf %110, %43 : vector<8x256xf32>
    %112 = arith.addf %107, %111 : vector<8x256xf32>
    %c12 = arith.constant 12 : index
    %c0_74 = arith.constant 0 : index
    %c0_75 = arith.constant 0 : index
    %113 = vector.load %arg4[%c12, %c0_74, %c0_75] : memref<49x8x1xf32, #tpu.memory_space<vmem>>, vector<1x8x1xf32>
    %114 = vector.shape_cast %113 : vector<1x8x1xf32> to vector<8x1xf32>
    %115 = vector.broadcast %114 : vector<8x1xf32> to vector<8x256xf32>
    %116 = arith.mulf %115, %47 : vector<8x256xf32>
    %117 = arith.addf %112, %116 : vector<8x256xf32>
    %c13 = arith.constant 13 : index
    %c0_76 = arith.constant 0 : index
    %c0_77 = arith.constant 0 : index
    %118 = vector.load %arg4[%c13, %c0_76, %c0_77] : memref<49x8x1xf32, #tpu.memory_space<vmem>>, vector<1x8x1xf32>
    %119 = vector.shape_cast %118 : vector<1x8x1xf32> to vector<8x1xf32>
    %120 = vector.broadcast %119 : vector<8x1xf32> to vector<8x256xf32>
    %121 = arith.mulf %120, %51 : vector<8x256xf32>
    %122 = arith.addf %117, %121 : vector<8x256xf32>
    %c1_78 = arith.constant 1 : index
    %c0_79 = arith.constant 0 : index
    %c128_80 = arith.constant 128 : index
    %123 = vector.load %arg8[%c1_78, %c0_79, %c128_80] : memref<7x8x512xf32, #tpu.memory_space<vmem>>, vector<1x8x256xf32>
    %124 = vector.shape_cast %123 : vector<1x8x256xf32> to vector<8x256xf32>
    %125 = vector.shape_cast %122 : vector<8x256xf32> to vector<1x8x256xf32>
    tpu.vector_store %arg8[%c1_78, %c0_79, %c128_80], %125 {strides = array<i32>} : memref<7x8x512xf32, #tpu.memory_space<vmem>>, vector<1x8x256xf32>,
    %c14 = arith.constant 14 : index
    %c0_81 = arith.constant 0 : index
    %c0_82 = arith.constant 0 : index
    %126 = vector.load %arg4[%c14, %c0_81, %c0_82] : memref<49x8x1xf32, #tpu.memory_space<vmem>>, vector<1x8x1xf32>
    %127 = vector.shape_cast %126 : vector<1x8x1xf32> to vector<8x1xf32>
    %128 = vector.broadcast %127 : vector<8x1xf32> to vector<8x256xf32>
    %129 = arith.mulf %128, %27 : vector<8x256xf32>
    %c15 = arith.constant 15 : index
    %c0_83 = arith.constant 0 : index
    %c0_84 = arith.constant 0 : index
    %130 = vector.load %arg4[%c15, %c0_83, %c0_84] : memref<49x8x1xf32, #tpu.memory_space<vmem>>, vector<1x8x1xf32>
    %131 = vector.shape_cast %130 : vector<1x8x1xf32> to vector<8x1xf32>
    %132 = vector.broadcast %131 : vector<8x1xf32> to vector<8x256xf32>
    %133 = arith.mulf %132, %31 : vector<8x256xf32>
    %134 = arith.addf %129, %133 : vector<8x256xf32>
    %c16 = arith.constant 16 : index
    %c0_85 = arith.constant 0 : index
    %c0_86 = arith.constant 0 : index
    %135 = vector.load %arg4[%c16, %c0_85, %c0_86] : memref<49x8x1xf32, #tpu.memory_space<vmem>>, vector<1x8x1xf32>
    %136 = vector.shape_cast %135 : vector<1x8x1xf32> to vector<8x1xf32>
    %137 = vector.broadcast %136 : vector<8x1xf32> to vector<8x256xf32>
    %138 = arith.mulf %137, %35 : vector<8x256xf32>
    %139 = arith.addf %134, %138 : vector<8x256xf32>
    %c17 = arith.constant 17 : index
    %c0_87 = arith.constant 0 : index
    %c0_88 = arith.constant 0 : index
    %140 = vector.load %arg4[%c17, %c0_87, %c0_88] : memref<49x8x1xf32, #tpu.memory_space<vmem>>, vector<1x8x1xf32>
    %141 = vector.shape_cast %140 : vector<1x8x1xf32> to vector<8x1xf32>
    %142 = vector.broadcast %141 : vector<8x1xf32> to vector<8x256xf32>
    %143 = arith.mulf %142, %39 : vector<8x256xf32>
    %144 = arith.addf %139, %143 : vector<8x256xf32>
    %c18 = arith.constant 18 : index
    %c0_89 = arith.constant 0 : index
    %c0_90 = arith.constant 0 : index
    %145 = vector.load %arg4[%c18, %c0_89, %c0_90] : memref<49x8x1xf32, #tpu.memory_space<vmem>>, vector<1x8x1xf32>
    %146 = vector.shape_cast %145 : vector<1x8x1xf32> to vector<8x1xf32>
    %147 = vector.broadcast %146 : vector<8x1xf32> to vector<8x256xf32>
    %148 = arith.mulf %147, %43 : vector<8x256xf32>
    %149 = arith.addf %144, %148 : vector<8x256xf32>
    %c19 = arith.constant 19 : index
    %c0_91 = arith.constant 0 : index
    %c0_92 = arith.constant 0 : index
    %150 = vector.load %arg4[%c19, %c0_91, %c0_92] : memref<49x8x1xf32, #tpu.memory_space<vmem>>, vector<1x8x1xf32>
    %151 = vector.shape_cast %150 : vector<1x8x1xf32> to vector<8x1xf32>
    %152 = vector.broadcast %151 : vector<8x1xf32> to vector<8x256xf32>
    %153 = arith.mulf %152, %47 : vector<8x256xf32>
    %154 = arith.addf %149, %153 : vector<8x256xf32>
    %c20 = arith.constant 20 : index
    %c0_93 = arith.constant 0 : index
    %c0_94 = arith.constant 0 : index
    %155 = vector.load %arg4[%c20, %c0_93, %c0_94] : memref<49x8x1xf32, #tpu.memory_space<vmem>>, vector<1x8x1xf32>
    %156 = vector.shape_cast %155 : vector<1x8x1xf32> to vector<8x1xf32>
    %157 = vector.broadcast %156 : vector<8x1xf32> to vector<8x256xf32>
    %158 = arith.mulf %157, %51 : vector<8x256xf32>
    %159 = arith.addf %154, %158 : vector<8x256xf32>
    %c2_95 = arith.constant 2 : index
    %c0_96 = arith.constant 0 : index
    %c128_97 = arith.constant 128 : index
    %160 = vector.load %arg8[%c2_95, %c0_96, %c128_97] : memref<7x8x512xf32, #tpu.memory_space<vmem>>, vector<1x8x256xf32>
    %161 = vector.shape_cast %160 : vector<1x8x256xf32> to vector<8x256xf32>
    %162 = vector.shape_cast %159 : vector<8x256xf32> to vector<1x8x256xf32>
    tpu.vector_store %arg8[%c2_95, %c0_96, %c128_97], %162 {strides = array<i32>} : memref<7x8x512xf32, #tpu.memory_space<vmem>>, vector<1x8x256xf32>,
    %c21 = arith.constant 21 : index
    %c0_98 = arith.constant 0 : index
    %c0_99 = arith.constant 0 : index
    %163 = vector.load %arg4[%c21, %c0_98, %c0_99] : memref<49x8x1xf32, #tpu.memory_space<vmem>>, vector<1x8x1xf32>
    %164 = vector.shape_cast %163 : vector<1x8x1xf32> to vector<8x1xf32>
    %165 = vector.broadcast %164 : vector<8x1xf32> to vector<8x256xf32>
    %166 = arith.mulf %165, %27 : vector<8x256xf32>
    %c22 = arith.constant 22 : index
    %c0_100 = arith.constant 0 : index
    %c0_101 = arith.constant 0 : index
    %167 = vector.load %arg4[%c22, %c0_100, %c0_101] : memref<49x8x1xf32, #tpu.memory_space<vmem>>, vector<1x8x1xf32>
    %168 = vector.shape_cast %167 : vector<1x8x1xf32> to vector<8x1xf32>
    %169 = vector.broadcast %168 : vector<8x1xf32> to vector<8x256xf32>
    %170 = arith.mulf %169, %31 : vector<8x256xf32>
    %171 = arith.addf %166, %170 : vector<8x256xf32>
    %c23 = arith.constant 23 : index
    %c0_102 = arith.constant 0 : index
    %c0_103 = arith.constant 0 : index
    %172 = vector.load %arg4[%c23, %c0_102, %c0_103] : memref<49x8x1xf32, #tpu.memory_space<vmem>>, vector<1x8x1xf32>
    %173 = vector.shape_cast %172 : vector<1x8x1xf32> to vector<8x1xf32>
    %174 = vector.broadcast %173 : vector<8x1xf32> to vector<8x256xf32>
    %175 = arith.mulf %174, %35 : vector<8x256xf32>
    %176 = arith.addf %171, %175 : vector<8x256xf32>
    %c24 = arith.constant 24 : index
    %c0_104 = arith.constant 0 : index
    %c0_105 = arith.constant 0 : index
    %177 = vector.load %arg4[%c24, %c0_104, %c0_105] : memref<49x8x1xf32, #tpu.memory_space<vmem>>, vector<1x8x1xf32>
    %178 = vector.shape_cast %177 : vector<1x8x1xf32> to vector<8x1xf32>
    %179 = vector.broadcast %178 : vector<8x1xf32> to vector<8x256xf32>
    %180 = arith.mulf %179, %39 : vector<8x256xf32>
    %181 = arith.addf %176, %180 : vector<8x256xf32>
    %c25 = arith.constant 25 : index
    %c0_106 = arith.constant 0 : index
    %c0_107 = arith.constant 0 : index
    %182 = vector.load %arg4[%c25, %c0_106, %c0_107] : memref<49x8x1xf32, #tpu.memory_space<vmem>>, vector<1x8x1xf32>
    %183 = vector.shape_cast %182 : vector<1x8x1xf32> to vector<8x1xf32>
    %184 = vector.broadcast %183 : vector<8x1xf32> to vector<8x256xf32>
    %185 = arith.mulf %184, %43 : vector<8x256xf32>
    %186 = arith.addf %181, %185 : vector<8x256xf32>
    %c26 = arith.constant 26 : index
    %c0_108 = arith.constant 0 : index
    %c0_109 = arith.constant 0 : index
    %187 = vector.load %arg4[%c26, %c0_108, %c0_109] : memref<49x8x1xf32, #tpu.memory_space<vmem>>, vector<1x8x1xf32>
    %188 = vector.shape_cast %187 : vector<1x8x1xf32> to vector<8x1xf32>
    %189 = vector.broadcast %188 : vector<8x1xf32> to vector<8x256xf32>
    %190 = arith.mulf %189, %47 : vector<8x256xf32>
    %191 = arith.addf %186, %190 : vector<8x256xf32>
    %c27 = arith.constant 27 : index
    %c0_110 = arith.constant 0 : index
    %c0_111 = arith.constant 0 : index
    %192 = vector.load %arg4[%c27, %c0_110, %c0_111] : memref<49x8x1xf32, #tpu.memory_space<vmem>>, vector<1x8x1xf32>
    %193 = vector.shape_cast %192 : vector<1x8x1xf32> to vector<8x1xf32>
    %194 = vector.broadcast %193 : vector<8x1xf32> to vector<8x256xf32>
    %195 = arith.mulf %194, %51 : vector<8x256xf32>
    %196 = arith.addf %191, %195 : vector<8x256xf32>
    %c3_112 = arith.constant 3 : index
    %c0_113 = arith.constant 0 : index
    %c128_114 = arith.constant 128 : index
    %197 = vector.load %arg8[%c3_112, %c0_113, %c128_114] : memref<7x8x512xf32, #tpu.memory_space<vmem>>, vector<1x8x256xf32>
    %198 = vector.shape_cast %197 : vector<1x8x256xf32> to vector<8x256xf32>
    %199 = vector.shape_cast %196 : vector<8x256xf32> to vector<1x8x256xf32>
    tpu.vector_store %arg8[%c3_112, %c0_113, %c128_114], %199 {strides = array<i32>} : memref<7x8x512xf32, #tpu.memory_space<vmem>>, vector<1x8x256xf32>,
    %c28 = arith.constant 28 : index
    %c0_115 = arith.constant 0 : index
    %c0_116 = arith.constant 0 : index
    %200 = vector.load %arg4[%c28, %c0_115, %c0_116] : memref<49x8x1xf32, #tpu.memory_space<vmem>>, vector<1x8x1xf32>
    %201 = vector.shape_cast %200 : vector<1x8x1xf32> to vector<8x1xf32>
    %202 = vector.broadcast %201 : vector<8x1xf32> to vector<8x256xf32>
    %203 = arith.mulf %202, %27 : vector<8x256xf32>
    %c29 = arith.constant 29 : index
    %c0_117 = arith.constant 0 : index
    %c0_118 = arith.constant 0 : index
    %204 = vector.load %arg4[%c29, %c0_117, %c0_118] : memref<49x8x1xf32, #tpu.memory_space<vmem>>, vector<1x8x1xf32>
    %205 = vector.shape_cast %204 : vector<1x8x1xf32> to vector<8x1xf32>
    %206 = vector.broadcast %205 : vector<8x1xf32> to vector<8x256xf32>
    %207 = arith.mulf %206, %31 : vector<8x256xf32>
    %208 = arith.addf %203, %207 : vector<8x256xf32>
    %c30 = arith.constant 30 : index
    %c0_119 = arith.constant 0 : index
    %c0_120 = arith.constant 0 : index
    %209 = vector.load %arg4[%c30, %c0_119, %c0_120] : memref<49x8x1xf32, #tpu.memory_space<vmem>>, vector<1x8x1xf32>
    %210 = vector.shape_cast %209 : vector<1x8x1xf32> to vector<8x1xf32>
    %211 = vector.broadcast %210 : vector<8x1xf32> to vector<8x256xf32>
    %212 = arith.mulf %211, %35 : vector<8x256xf32>
    %213 = arith.addf %208, %212 : vector<8x256xf32>
    %c31 = arith.constant 31 : index
    %c0_121 = arith.constant 0 : index
    %c0_122 = arith.constant 0 : index
    %214 = vector.load %arg4[%c31, %c0_121, %c0_122] : memref<49x8x1xf32, #tpu.memory_space<vmem>>, vector<1x8x1xf32>
    %215 = vector.shape_cast %214 : vector<1x8x1xf32> to vector<8x1xf32>
    %216 = vector.broadcast %215 : vector<8x1xf32> to vector<8x256xf32>
    %217 = arith.mulf %216, %39 : vector<8x256xf32>
    %218 = arith.addf %213, %217 : vector<8x256xf32>
    %c32 = arith.constant 32 : index
    %c0_123 = arith.constant 0 : index
    %c0_124 = arith.constant 0 : index
    %219 = vector.load %arg4[%c32, %c0_123, %c0_124] : memref<49x8x1xf32, #tpu.memory_space<vmem>>, vector<1x8x1xf32>
    %220 = vector.shape_cast %219 : vector<1x8x1xf32> to vector<8x1xf32>
    %221 = vector.broadcast %220 : vector<8x1xf32> to vector<8x256xf32>
    %222 = arith.mulf %221, %43 : vector<8x256xf32>
    %223 = arith.addf %218, %222 : vector<8x256xf32>
    %c33 = arith.constant 33 : index
    %c0_125 = arith.constant 0 : index
    %c0_126 = arith.constant 0 : index
    %224 = vector.load %arg4[%c33, %c0_125, %c0_126] : memref<49x8x1xf32, #tpu.memory_space<vmem>>, vector<1x8x1xf32>
    %225 = vector.shape_cast %224 : vector<1x8x1xf32> to vector<8x1xf32>
    %226 = vector.broadcast %225 : vector<8x1xf32> to vector<8x256xf32>
    %227 = arith.mulf %226, %47 : vector<8x256xf32>
    %228 = arith.addf %223, %227 : vector<8x256xf32>
    %c34 = arith.constant 34 : index
    %c0_127 = arith.constant 0 : index
    %c0_128 = arith.constant 0 : index
    %229 = vector.load %arg4[%c34, %c0_127, %c0_128] : memref<49x8x1xf32, #tpu.memory_space<vmem>>, vector<1x8x1xf32>
    %230 = vector.shape_cast %229 : vector<1x8x1xf32> to vector<8x1xf32>
    %231 = vector.broadcast %230 : vector<8x1xf32> to vector<8x256xf32>
    %232 = arith.mulf %231, %51 : vector<8x256xf32>
    %233 = arith.addf %228, %232 : vector<8x256xf32>
    %c4_129 = arith.constant 4 : index
    %c0_130 = arith.constant 0 : index
    %c128_131 = arith.constant 128 : index
    %234 = vector.load %arg8[%c4_129, %c0_130, %c128_131] : memref<7x8x512xf32, #tpu.memory_space<vmem>>, vector<1x8x256xf32>
    %235 = vector.shape_cast %234 : vector<1x8x256xf32> to vector<8x256xf32>
    %236 = vector.shape_cast %233 : vector<8x256xf32> to vector<1x8x256xf32>
    tpu.vector_store %arg8[%c4_129, %c0_130, %c128_131], %236 {strides = array<i32>} : memref<7x8x512xf32, #tpu.memory_space<vmem>>, vector<1x8x256xf32>,
    %c35 = arith.constant 35 : index
    %c0_132 = arith.constant 0 : index
    %c0_133 = arith.constant 0 : index
    %237 = vector.load %arg4[%c35, %c0_132, %c0_133] : memref<49x8x1xf32, #tpu.memory_space<vmem>>, vector<1x8x1xf32>
    %238 = vector.shape_cast %237 : vector<1x8x1xf32> to vector<8x1xf32>
    %239 = vector.broadcast %238 : vector<8x1xf32> to vector<8x256xf32>
    %240 = arith.mulf %239, %27 : vector<8x256xf32>
    %c36 = arith.constant 36 : index
    %c0_134 = arith.constant 0 : index
    %c0_135 = arith.constant 0 : index
    %241 = vector.load %arg4[%c36, %c0_134, %c0_135] : memref<49x8x1xf32, #tpu.memory_space<vmem>>, vector<1x8x1xf32>
    %242 = vector.shape_cast %241 : vector<1x8x1xf32> to vector<8x1xf32>
    %243 = vector.broadcast %242 : vector<8x1xf32> to vector<8x256xf32>
    %244 = arith.mulf %243, %31 : vector<8x256xf32>
    %245 = arith.addf %240, %244 : vector<8x256xf32>
    %c37 = arith.constant 37 : index
    %c0_136 = arith.constant 0 : index
    %c0_137 = arith.constant 0 : index
    %246 = vector.load %arg4[%c37, %c0_136, %c0_137] : memref<49x8x1xf32, #tpu.memory_space<vmem>>, vector<1x8x1xf32>
    %247 = vector.shape_cast %246 : vector<1x8x1xf32> to vector<8x1xf32>
    %248 = vector.broadcast %247 : vector<8x1xf32> to vector<8x256xf32>
    %249 = arith.mulf %248, %35 : vector<8x256xf32>
    %250 = arith.addf %245, %249 : vector<8x256xf32>
    %c38 = arith.constant 38 : index
    %c0_138 = arith.constant 0 : index
    %c0_139 = arith.constant 0 : index
    %251 = vector.load %arg4[%c38, %c0_138, %c0_139] : memref<49x8x1xf32, #tpu.memory_space<vmem>>, vector<1x8x1xf32>
    %252 = vector.shape_cast %251 : vector<1x8x1xf32> to vector<8x1xf32>
    %253 = vector.broadcast %252 : vector<8x1xf32> to vector<8x256xf32>
    %254 = arith.mulf %253, %39 : vector<8x256xf32>
    %255 = arith.addf %250, %254 : vector<8x256xf32>
    %c39 = arith.constant 39 : index
    %c0_140 = arith.constant 0 : index
    %c0_141 = arith.constant 0 : index
    %256 = vector.load %arg4[%c39, %c0_140, %c0_141] : memref<49x8x1xf32, #tpu.memory_space<vmem>>, vector<1x8x1xf32>
    %257 = vector.shape_cast %256 : vector<1x8x1xf32> to vector<8x1xf32>
    %258 = vector.broadcast %257 : vector<8x1xf32> to vector<8x256xf32>
    %259 = arith.mulf %258, %43 : vector<8x256xf32>
    %260 = arith.addf %255, %259 : vector<8x256xf32>
    %c40 = arith.constant 40 : index
    %c0_142 = arith.constant 0 : index
    %c0_143 = arith.constant 0 : index
    %261 = vector.load %arg4[%c40, %c0_142, %c0_143] : memref<49x8x1xf32, #tpu.memory_space<vmem>>, vector<1x8x1xf32>
    %262 = vector.shape_cast %261 : vector<1x8x1xf32> to vector<8x1xf32>
    %263 = vector.broadcast %262 : vector<8x1xf32> to vector<8x256xf32>
    %264 = arith.mulf %263, %47 : vector<8x256xf32>
    %265 = arith.addf %260, %264 : vector<8x256xf32>
    %c41 = arith.constant 41 : index
    %c0_144 = arith.constant 0 : index
    %c0_145 = arith.constant 0 : index
    %266 = vector.load %arg4[%c41, %c0_144, %c0_145] : memref<49x8x1xf32, #tpu.memory_space<vmem>>, vector<1x8x1xf32>
    %267 = vector.shape_cast %266 : vector<1x8x1xf32> to vector<8x1xf32>
    %268 = vector.broadcast %267 : vector<8x1xf32> to vector<8x256xf32>
    %269 = arith.mulf %268, %51 : vector<8x256xf32>
    %270 = arith.addf %265, %269 : vector<8x256xf32>
    %c5_146 = arith.constant 5 : index
    %c0_147 = arith.constant 0 : index
    %c128_148 = arith.constant 128 : index
    %271 = vector.load %arg8[%c5_146, %c0_147, %c128_148] : memref<7x8x512xf32, #tpu.memory_space<vmem>>, vector<1x8x256xf32>
    %272 = vector.shape_cast %271 : vector<1x8x256xf32> to vector<8x256xf32>
    %273 = vector.shape_cast %270 : vector<8x256xf32> to vector<1x8x256xf32>
    tpu.vector_store %arg8[%c5_146, %c0_147, %c128_148], %273 {strides = array<i32>} : memref<7x8x512xf32, #tpu.memory_space<vmem>>, vector<1x8x256xf32>,
    %c42 = arith.constant 42 : index
    %c0_149 = arith.constant 0 : index
    %c0_150 = arith.constant 0 : index
    %274 = vector.load %arg4[%c42, %c0_149, %c0_150] : memref<49x8x1xf32, #tpu.memory_space<vmem>>, vector<1x8x1xf32>
    %275 = vector.shape_cast %274 : vector<1x8x1xf32> to vector<8x1xf32>
    %276 = vector.broadcast %275 : vector<8x1xf32> to vector<8x256xf32>
    %277 = arith.mulf %276, %27 : vector<8x256xf32>
    %c43 = arith.constant 43 : index
    %c0_151 = arith.constant 0 : index
    %c0_152 = arith.constant 0 : index
    %278 = vector.load %arg4[%c43, %c0_151, %c0_152] : memref<49x8x1xf32, #tpu.memory_space<vmem>>, vector<1x8x1xf32>
    %279 = vector.shape_cast %278 : vector<1x8x1xf32> to vector<8x1xf32>
    %280 = vector.broadcast %279 : vector<8x1xf32> to vector<8x256xf32>
    %281 = arith.mulf %280, %31 : vector<8x256xf32>
    %282 = arith.addf %277, %281 : vector<8x256xf32>
    %c44 = arith.constant 44 : index
    %c0_153 = arith.constant 0 : index
    %c0_154 = arith.constant 0 : index
    %283 = vector.load %arg4[%c44, %c0_153, %c0_154] : memref<49x8x1xf32, #tpu.memory_space<vmem>>, vector<1x8x1xf32>
    %284 = vector.shape_cast %283 : vector<1x8x1xf32> to vector<8x1xf32>
    %285 = vector.broadcast %284 : vector<8x1xf32> to vector<8x256xf32>
    %286 = arith.mulf %285, %35 : vector<8x256xf32>
    %287 = arith.addf %282, %286 : vector<8x256xf32>
    %c45 = arith.constant 45 : index
    %c0_155 = arith.constant 0 : index
    %c0_156 = arith.constant 0 : index
    %288 = vector.load %arg4[%c45, %c0_155, %c0_156] : memref<49x8x1xf32, #tpu.memory_space<vmem>>, vector<1x8x1xf32>
    %289 = vector.shape_cast %288 : vector<1x8x1xf32> to vector<8x1xf32>
    %290 = vector.broadcast %289 : vector<8x1xf32> to vector<8x256xf32>
    %291 = arith.mulf %290, %39 : vector<8x256xf32>
    %292 = arith.addf %287, %291 : vector<8x256xf32>
    %c46 = arith.constant 46 : index
    %c0_157 = arith.constant 0 : index
    %c0_158 = arith.constant 0 : index
    %293 = vector.load %arg4[%c46, %c0_157, %c0_158] : memref<49x8x1xf32, #tpu.memory_space<vmem>>, vector<1x8x1xf32>
    %294 = vector.shape_cast %293 : vector<1x8x1xf32> to vector<8x1xf32>
    %295 = vector.broadcast %294 : vector<8x1xf32> to vector<8x256xf32>
    %296 = arith.mulf %295, %43 : vector<8x256xf32>
    %297 = arith.addf %292, %296 : vector<8x256xf32>
    %c47 = arith.constant 47 : index
    %c0_159 = arith.constant 0 : index
    %c0_160 = arith.constant 0 : index
    %298 = vector.load %arg4[%c47, %c0_159, %c0_160] : memref<49x8x1xf32, #tpu.memory_space<vmem>>, vector<1x8x1xf32>
    %299 = vector.shape_cast %298 : vector<1x8x1xf32> to vector<8x1xf32>
    %300 = vector.broadcast %299 : vector<8x1xf32> to vector<8x256xf32>
    %301 = arith.mulf %300, %47 : vector<8x256xf32>
    %302 = arith.addf %297, %301 : vector<8x256xf32>
    %c48 = arith.constant 48 : index
    %c0_161 = arith.constant 0 : index
    %c0_162 = arith.constant 0 : index
    %303 = vector.load %arg4[%c48, %c0_161, %c0_162] : memref<49x8x1xf32, #tpu.memory_space<vmem>>, vector<1x8x1xf32>
    %304 = vector.shape_cast %303 : vector<1x8x1xf32> to vector<8x1xf32>
    %305 = vector.broadcast %304 : vector<8x1xf32> to vector<8x256xf32>
    %306 = arith.mulf %305, %51 : vector<8x256xf32>
    %307 = arith.addf %302, %306 : vector<8x256xf32>
    %c6_163 = arith.constant 6 : index
    %c0_164 = arith.constant 0 : index
    %c128_165 = arith.constant 128 : index
    %308 = vector.load %arg8[%c6_163, %c0_164, %c128_165] : memref<7x8x512xf32, #tpu.memory_space<vmem>>, vector<1x8x256xf32>
    %309 = vector.shape_cast %308 : vector<1x8x256xf32> to vector<8x256xf32>
    %310 = vector.shape_cast %307 : vector<8x256xf32> to vector<1x8x256xf32>
    tpu.vector_store %arg8[%c6_163, %c0_164, %c128_165], %310 {strides = array<i32>} : memref<7x8x512xf32, #tpu.memory_space<vmem>>, vector<1x8x256xf32>,
    %cst_166 = arith.constant 0.000000e+00 : f32
    %311 = vector.broadcast %cst_166 : f32 to vector<8x256xf32>
    %c0_167 = arith.constant 0 : index
    %c0_168 = arith.constant 0 : index
    %c80 = arith.constant 80 : index
    %312 = vector.load %arg8[%c0_167, %c0_168, %c80] : memref<7x8x512xf32, #tpu.memory_space<vmem>>, vector<1x8x256xf32>
    %313 = vector.shape_cast %312 : vector<1x8x256xf32> to vector<8x256xf32>
    %314 = arith.addf %311, %313 : vector<8x256xf32>
    %c1_169 = arith.constant 1 : index
    %c0_170 = arith.constant 0 : index
    %c96 = arith.constant 96 : index
    %315 = vector.load %arg8[%c1_169, %c0_170, %c96] : memref<7x8x512xf32, #tpu.memory_space<vmem>>, vector<1x8x256xf32>
    %316 = vector.shape_cast %315 : vector<1x8x256xf32> to vector<8x256xf32>
    %317 = arith.addf %314, %316 : vector<8x256xf32>
    %c2_171 = arith.constant 2 : index
    %c0_172 = arith.constant 0 : index
    %c112 = arith.constant 112 : index
    %318 = vector.load %arg8[%c2_171, %c0_172, %c112] : memref<7x8x512xf32, #tpu.memory_space<vmem>>, vector<1x8x256xf32>
    %319 = vector.shape_cast %318 : vector<1x8x256xf32> to vector<8x256xf32>
    %320 = arith.addf %317, %319 : vector<8x256xf32>
    %c3_173 = arith.constant 3 : index
    %c0_174 = arith.constant 0 : index
    %c128_175 = arith.constant 128 : index
    %321 = vector.load %arg8[%c3_173, %c0_174, %c128_175] : memref<7x8x512xf32, #tpu.memory_space<vmem>>, vector<1x8x256xf32>
    %322 = vector.shape_cast %321 : vector<1x8x256xf32> to vector<8x256xf32>
    %323 = arith.addf %320, %322 : vector<8x256xf32>
    %c4_176 = arith.constant 4 : index
    %c0_177 = arith.constant 0 : index
    %c144 = arith.constant 144 : index
    %324 = vector.load %arg8[%c4_176, %c0_177, %c144] : memref<7x8x512xf32, #tpu.memory_space<vmem>>, vector<1x8x256xf32>
    %325 = vector.shape_cast %324 : vector<1x8x256xf32> to vector<8x256xf32>
    %326 = arith.addf %323, %325 : vector<8x256xf32>
    %c5_178 = arith.constant 5 : index
    %c0_179 = arith.constant 0 : index
    %c160 = arith.constant 160 : index
    %327 = vector.load %arg8[%c5_178, %c0_179, %c160] : memref<7x8x512xf32, #tpu.memory_space<vmem>>, vector<1x8x256xf32>
    %328 = vector.shape_cast %327 : vector<1x8x256xf32> to vector<8x256xf32>
    %329 = arith.addf %326, %328 : vector<8x256xf32>
    %c6_180 = arith.constant 6 : index
    %c0_181 = arith.constant 0 : index
    %c176 = arith.constant 176 : index
    %330 = vector.load %arg8[%c6_180, %c0_181, %c176] : memref<7x8x512xf32, #tpu.memory_space<vmem>>, vector<1x8x256xf32>
    %331 = vector.shape_cast %330 : vector<1x8x256xf32> to vector<8x256xf32>
    %332 = arith.addf %329, %331 : vector<8x256xf32>
    %333 = vector.extract_strided_slice %332 {offsets = [0, 0], sizes = [4, 256], strides = [1, 1]} : vector<8x256xf32> to vector<4x256xf32>
    %334 = vector.extract_strided_slice %332 {offsets = [4, 0], sizes = [4, 256], strides = [1, 1]} : vector<8x256xf32> to vector<4x256xf32>
    %335 = arith.addf %333, %334 : vector<4x256xf32>
    %c0_182 = arith.constant 0 : index
    %336 = memref.load %arg5[%c0_182] : memref<2xf32, #tpu.memory_space<smem>>
    %337 = vector.broadcast %336 : f32 to vector<4x256xf32>
    %338 = arith.mulf %335, %337 : vector<4x256xf32>
    %c1_183 = arith.constant 1 : index
    %339 = memref.load %arg5[%c1_183] : memref<2xf32, #tpu.memory_space<smem>>
    %340 = vector.broadcast %339 : f32 to vector<4x256xf32>
    %341 = arith.addf %338, %340 : vector<4x256xf32>
    %cst_184 = arith.constant 0.000000e+00 : f32
    %342 = vector.broadcast %cst_184 : f32 to vector<4x256xf32>
    %343 = arith.maximumf %341, %342 : vector<4x256xf32>
    %344 = arith.negf %343 : vector<4x256xf32>
    %345 = math.exp %344 : vector<4x256xf32>
    %cst_185 = arith.constant 1.000000e+00 : f32
    %346 = vector.broadcast %cst_185 : f32 to vector<4x256xf32>
    %347 = arith.addf %346, %345 : vector<4x256xf32>
    %348 = arith.divf %346, %347 : vector<4x256xf32>
    %349 = vector.extract_strided_slice %348 {offsets = [0, 0], sizes = [1, 256], strides = [1, 1]} : vector<4x256xf32> to vector<1x256xf32>
    %350 = vector.extract_strided_slice %348 {offsets = [2, 0], sizes = [1, 256], strides = [1, 1]} : vector<4x256xf32> to vector<1x256xf32>
    %351 = vector.extract_strided_slice %8 {offsets = [0, 0, 0], sizes = [1, 4, 256], strides = [1, 1, 1]} : vector<2x4x256xf32> to vector<1x4x256xf32>
    %352 = vector.shape_cast %351 : vector<1x4x256xf32> to vector<4x256xf32>
    %353 = vector.broadcast %350 : vector<1x256xf32> to vector<4x256xf32>
    %354 = arith.mulf %352, %353 : vector<4x256xf32>
    %355 = vector.extract_strided_slice %11 {offsets = [0, 0, 0], sizes = [1, 4, 256], strides = [1, 1, 1]} : vector<2x4x256xf32> to vector<1x4x256xf32>
    %356 = vector.shape_cast %355 : vector<1x4x256xf32> to vector<4x256xf32>
    %357 = arith.subf %349, %350 : vector<1x256xf32>
    %358 = vector.broadcast %357 : vector<1x256xf32> to vector<4x256xf32>
    %359 = arith.mulf %356, %358 : vector<4x256xf32>
    %360 = arith.addf %354, %359 : vector<4x256xf32>
    %c0_186 = arith.constant 0 : index
    %c0_187 = arith.constant 0 : index
    %c0_188 = arith.constant 0 : index
    %361 = vector.load %arg6[%c0_186, %c0_187, %c0_188] : memref<2x4x256xf32, #tpu.memory_space<vmem>>, vector<1x4x256xf32>
    %362 = vector.shape_cast %361 : vector<1x4x256xf32> to vector<4x256xf32>
    %363 = vector.shape_cast %360 : vector<4x256xf32> to vector<1x4x256xf32>
    tpu.vector_store %arg6[%c0_186, %c0_187, %c0_188], %363 {strides = array<i32>} : memref<2x4x256xf32, #tpu.memory_space<vmem>>, vector<1x4x256xf32>,
    %364 = vector.extract_strided_slice %348 {offsets = [1, 0], sizes = [1, 256], strides = [1, 1]} : vector<4x256xf32> to vector<1x256xf32>
    %365 = vector.extract_strided_slice %348 {offsets = [3, 0], sizes = [1, 256], strides = [1, 1]} : vector<4x256xf32> to vector<1x256xf32>
    %366 = vector.extract_strided_slice %8 {offsets = [1, 0, 0], sizes = [1, 4, 256], strides = [1, 1, 1]} : vector<2x4x256xf32> to vector<1x4x256xf32>
    %367 = vector.shape_cast %366 : vector<1x4x256xf32> to vector<4x256xf32>
    %368 = vector.broadcast %365 : vector<1x256xf32> to vector<4x256xf32>
    %369 = arith.mulf %367, %368 : vector<4x256xf32>
    %370 = vector.extract_strided_slice %11 {offsets = [1, 0, 0], sizes = [1, 4, 256], strides = [1, 1, 1]} : vector<2x4x256xf32> to vector<1x4x256xf32>
    %371 = vector.shape_cast %370 : vector<1x4x256xf32> to vector<4x256xf32>
    %372 = arith.subf %364, %365 : vector<1x256xf32>
    %373 = vector.broadcast %372 : vector<1x256xf32> to vector<4x256xf32>
    %374 = arith.mulf %371, %373 : vector<4x256xf32>
    %375 = arith.addf %369, %374 : vector<4x256xf32>
    %c1_189 = arith.constant 1 : index
    %c0_190 = arith.constant 0 : index
    %c0_191 = arith.constant 0 : index
    %376 = vector.load %arg6[%c1_189, %c0_190, %c0_191] : memref<2x4x256xf32, #tpu.memory_space<vmem>>, vector<1x4x256xf32>
    %377 = vector.shape_cast %376 : vector<1x4x256xf32> to vector<4x256xf32>
    %378 = vector.shape_cast %375 : vector<4x256xf32> to vector<1x4x256xf32>
    tpu.vector_store %arg6[%c1_189, %c0_190, %c0_191], %378 {strides = array<i32>} : memref<2x4x256xf32, #tpu.memory_space<vmem>>, vector<1x4x256xf32>,
    return
  }
  func.func @transform_0(%arg0: i32) -> (i32, i32, i32) {
    %c0_i32 = arith.constant 0 : i32
    %c0_i32_0 = arith.constant 0 : i32
    %c0_i32_1 = arith.constant 0 : i32
    return %arg0, %c0_i32, %c0_i32_0 : i32, i32, i32
  }
  func.func @transform_1(%arg0: i32) -> (i32, i32, i32) {
    %c0_i32 = arith.constant 0 : i32
    %c0_i32_0 = arith.constant 0 : i32
    %c0_i32_1 = arith.constant 0 : i32
    return %arg0, %c0_i32, %c0_i32_0 : i32, i32, i32
  }
  func.func @transform_2(%arg0: i32) -> (i32, i32) {
    %c0_i32 = arith.constant 0 : i32
    %c0_i32_0 = arith.constant 0 : i32
    %c0_i32_1 = arith.constant 0 : i32
    return %c0_i32, %c0_i32_0 : i32, i32
  }
  func.func @transform_3(%arg0: i32) -> (i32, i32, i32) {
    %c0_i32 = arith.constant 0 : i32
    %c0_i32_0 = arith.constant 0 : i32
    %c0_i32_1 = arith.constant 0 : i32
    %c0_i32_2 = arith.constant 0 : i32
    return %c0_i32, %c0_i32_0, %c0_i32_1 : i32, i32, i32
  }
  func.func @transform_4(%arg0: i32) -> i32 {
    %c0_i32 = arith.constant 0 : i32
    %c0_i32_0 = arith.constant 0 : i32
    return %c0_i32 : i32
  }
  func.func @transform_5(%arg0: i32) -> (i32, i32, i32) {
    %c0_i32 = arith.constant 0 : i32
    %c0_i32_0 = arith.constant 0 : i32
    %c0_i32_1 = arith.constant 0 : i32
    return %arg0, %c0_i32, %c0_i32_0 : i32, i32, i32
  }
}

</mosaic_0001>

<bundles_post_ra>
// kernel: tpu_custom_call.1
= control target key start
LH: loop header
LB: loop body
LE: loop exit
PB: predicated region body
PF: predicated region fallthrough
CT: control target
= control target key end

     0   :  { %10 = vsyncpa [#allocation6], 0  ;;  %s3507_s0 = inlined_call_operand.vmem [shape: f32[2,4,256], index: 0, kind: input, shape index: {}]   ;;  %s3508_s1 = inlined_call_operand.vmem [shape: f32[2,4,1], index: 1, kind: input, shape index: {}]   ;;  %s3509_s2 = inlined_call_operand.vmem [shape: f32[7,256], index: 2, kind: input, shape index: {}]   ;;  %s3510_s3 = inlined_call_operand.vmem [shape: f32[49,8,1], index: 3, kind: input, shape index: {}]   ;;  %s3511_s4 = inlined_call_operand.vmem [shape: f32[2], index: 4, kind: input, shape index: {}]   ;;  %s3512_s5 = inlined_call_operand.hbm [shape: f32[2,4,256], index: 5, kind: output, shape index: {}]  }
   0x1   :  { %11 = vsyncpa [#allocation5], 0  ;;  %s26_s20 = sshll.u32 %s3511_s4, 4  ;;  %s27_s20 = int_to_ptr.vmem [resolvable:$true] %s26_s20 }
   0x2   :  { %s2117_s21 = scalar_lea.vmem %s27_s20, 16  ;;  %p2122_p1 = scmp.lt.s32.totalorder %s27_s20, %s27_s20 }
   0x3   :  { %p2118_p0 = scmp.ne.s32.totalorder %s27_s20, %s2117_s21  ;;  %p2123_p2 = scmp.lt.s32.totalorder %s2117_s21, %s2117_s21 }
   0x5   :  { %p2124_p3 = por %p2123_p2, %p2122_p1 }
   0x7   :  { %p2125_p4 = pnand %p2124_p3, %p2118_p0 }
   0x9   :  { %2128 = shalt.err (!%p2125_p4)
}
   0xa   :  { %s2155_s22 = smov [#allocation4]  }
   0xb   :  { %29 = dma.vmem_to_smem %s27_s20, 16, %s2155_s22, [#allocation6]  }
   0xc   :  { %2151 = dma.done.wait [#allocation6], 16  }
   0xd   :  { %2152 = vsyncadd [#allocation6], 4294967280 }
   0xe   :  { %33 = sfence }
   0xf   :  { %v52_v0 = vld [vmem:[%s3508_s1] sm:$0xf]  ;;  %v65_v1 = vlaneseq  ;;  %v2156_v2 = vmov 0   ;;  %v53_v3 = vld [vmem:[%s3508_s1 + $0x4] sm:$0xf]  ;;  %s2157_s6 = smov 125  }
  0x10   :  { %2099 = vset.pattern.permute.xlu0 %v2156_v2  ;;  %2100 = vset.pattern.permute.xlu1 %v2156_v2  ;;  %v274_v5 = vld [vmem:[%s3509_s2] ss:$8 sm:$0x3]  ;;  %v2019_v6 = vld [vmem:[%s3509_s2 + $0x1] ss:$8 sm:$0x3] }
  0x11   :  { %56 = vperm.xlu0 %2099, %v52_v0   ;;  %v2216_v4 = vshrl.u32 %v65_v1, 7  ;;  %v2020_v11 = vld [vmem:[%s3509_s2 + $0x2] ss:$8 sm:$0x3]  ;;  %s2158_s7 = smov 126   ;;  %s2159_s10 = smov 127  }
  0x12   :  { %v2022_v14 = vld [vmem:[%s3509_s2 + $0x4] ss:$8 sm:$0x3]  ;;  %v2023_v17 = vld [vmem:[%s3509_s2 + $0x5] ss:$8 sm:$0x3] }
  0x13   :  { %3528 = vst [vmem:[#allocation10_spill] sm:$0xff] %v2216_v4  ;;  %v2225_v7 = vsub.s32 0, %v2216_v4  ;;  %v2228_v8 = vsub.s32 1, %v2216_v4  ;;  %s2160_s13 = smov 1   ;;  %s2161_s16 = smov 2   ;;  %v429_v24 = vld [vmem:[%s3510_s3] sm:$0xff] }
  0x14   :  { %v2024_v20 = vld [vmem:[%s3509_s2 + $0x6] ss:$8 sm:$0x3]  ;;  %s2162_s17 = smov 3   ;;  %v2026_v29 = vld [vmem:[%s3510_s3 + $0x10] sm:$0xff]  ;;  %v2027_v31 = vld [vmem:[%s3510_s3 + $0x18] sm:$0xff] }
  0x15   :  { %3529 = vst [vmem:[#allocation11_spill] sm:$0xff] %v2225_v7  ;;  %3530 = vst [vmem:[#allocation12_spill] sm:$0xff] %v2228_v8  ;;  %60 = vperm.xlu0 %2099, %v53_v3   ;;  %v279_v9 = vrot.slane %v274_v5, %v2225_v7  ;;  %v302_v10 = vrot.slane %v2019_v6, %v2225_v7  ;;  %v283_v12 = vrot.slane %v274_v5, %v2228_v8  ;;  %v2028_v26 = vld [vmem:[%s3510_s3 + $0x20] sm:$0xff]  ;;  %v2025_v27 = vld [vmem:[%s3510_s3 + $0x8] sm:$0xff]  ;;  %v2163_v56 = vmov 839922192  }
  0x16   :  { %v325_v13 = vrot.slane %v2020_v11, %v2225_v7  ;;  %v306_v15 = vrot.slane %v2019_v6, %v2228_v8  ;;  %v366_v16 = vrot.slane %v2022_v14, %v2225_v7  ;;  %v329_v18 = vrot.slane %v2020_v11, %v2228_v8  ;;  %v2029_v28 = vld [vmem:[%s3510_s3 + $0x28] sm:$0xff]  ;;  %v2030_v30 = vld [vmem:[%s3510_s3 + $0x30] sm:$0xff]  ;;  %v2032_v32 = vld [vmem:[%s3510_s3 + $0x40] sm:$0xff]  ;;  %s2164_s14 = smov 124   ;;  %s2165_s15 = smov 123  }
  0x17   :  { %284 = vrot.lane.b32.xlu1 %v279_v9, %s2157_s6  ;;  %v389_v19 = vrot.slane %v2023_v17, %v2225_v7  ;;  %v370_v21 = vrot.slane %v2022_v14, %v2228_v8  ;;  %v412_v22 = vrot.slane %v2024_v20, %v2225_v7  ;;  %v393_v23 = vrot.slane %v2023_v17, %v2228_v8  ;;  %v2031_v33 = vld [vmem:[%s3510_s3 + $0x38] sm:$0xff]  ;;  %v2033_v34 = vld [vmem:[%s3510_s3 + $0x48] sm:$0xff]  ;;  %v2034_v36 = vld [vmem:[%s3510_s3 + $0x50] sm:$0xff]  ;;  %s2174_s12 = smov [#allocation7]  }
  0x18   :  { %v416_v25 = vrot.slane %v2024_v20, %v2228_v8  ;;  %v2035_v35 = vld [vmem:[%s3510_s3 + $0x58] sm:$0xff]  ;;  %v2036_v37 = vld [vmem:[%s3510_s3 + $0x60] sm:$0xff]  ;;  %v2038_v38 = vld [vmem:[%s3510_s3 + $0x70] sm:$0xff]  ;;  %v63_v57 = vunpack.c.l.s4 %v2163_v56  ;;  %vm86_vm0 = vcmask 1043456   ;;  %vm229_vm1 = vcmask 1041409  }
  0x19   :  { %307 = vrot.lane.b32.xlu0 %v302_v10, %s2158_s7  ;;  %v2037_v39 = vld [vmem:[%s3510_s3 + $0x68] sm:$0xff]  ;;  %v2046_v40 = vld [vmem:[%s3510_s3 + $0xb0] sm:$0xff]  ;;  %v2039_v41 = vld [vmem:[%s3510_s3 + $0x78] sm:$0xff]  ;;  %vm238_vm2 = vcmask 1043459   ;;  %vm247_vm3 = vcmask 1045509   ;;  %vm261_vm4 = vcmask 1041408  }
  0x1a   :  { %v2047_v42 = vld [vmem:[%s3510_s3 + $0xb8] sm:$0xff]  ;;  %v2040_v43 = vld [vmem:[%s3510_s3 + $0x80] sm:$0xff]  ;;  %v2042_v44 = vld [vmem:[%s3510_s3 + $0x90] sm:$0xff]  ;;  %v64_v58 = vunpack.c.0.s8 %v63_v57  ;;  %vm256_vm5 = vcmask 1047559   ;;  %vm266_vm6 = vcmask 1045504   ;;  %vm311_vm7 = vcmask 1031168  }
  0x1b   :  { %286 = vrot.lane.b32.xlu1 %v283_v12, %s2157_s6  ;;  %v2041_v45 = vld [vmem:[%s3510_s3 + $0x88] sm:$0xff]  ;;  %v2054_v46 = vld [vmem:[%s3510_s3 + $0xf0] sm:$0xff]  ;;  %v2043_v48 = vld [vmem:[%s3510_s3 + $0x98] sm:$0xff]  ;;  %vm334_vm8 = vcmask 1039360   ;;  %vm375_vm9 = vcmask 7168   ;;  %vm398_vm10 = vcmask 15360  }
  0x1c   :  { %v2053_v47 = vld [vmem:[%s3510_s3 + $0xe8] sm:$0xff]  ;;  %v2048_v49 = vld [vmem:[%s3510_s3 + $0xc0] sm:$0xff]  ;;  %v2055_v50 = vld [vmem:[%s3510_s3 + $0xf8] sm:$0xff]  ;;  %v67_v60 = vsub.s32 %v64_v58, %v2216_v4  ;;  %vm421_vm11 = vcmask 23552   ;;  %vm288_vm12 = vcmask 1022976   ;;  %vm533_vm13 = vcmask 1014784  }
  0x1d   :  { %330 = vrot.lane.b32.xlu0 %v325_v13, %s2159_s10  ;;  %v2060_v51 = vld [vmem:[%s3510_s3 + $0x120] sm:$0xff]  ;;  %v2067_v52 = vld [vmem:[%s3510_s3 + $0x158] sm:$0xff]  ;;  %v2049_v53 = vld [vmem:[%s3510_s3 + $0xc8] sm:$0xff]  ;;  %vm561_vm14 = vcmask 1006592   ;;  %vm589_vm15 = vcmask 998400  }
  0x1e   :  { %v2061_v54 = vld [vmem:[%s3510_s3 + $0x128] sm:$0xff]  ;;  %v2044_v55 = vld [vmem:[%s3510_s3 + $0xa0] sm:$0xff] }
  0x1f   :  { %309 = vrot.lane.b32.xlu1 %v306_v15, %s2158_s7  ;;  %v50_v63 = vld [vmem:[%s3507_s0] sm:$0xff]  ;;  %v51_v6 = vld [vmem:[%s3507_s0 + $0x8] sm:$0xff] }
  0x20   :  { %v87_v3 = vsel %vm86_vm0, %v50_v63, 0.0  ;;  %v101_v11 = vsel %vm86_vm0, %v51_v6, 0.0 }
  0x21   :  { %371 = vrot.lane.b32.xlu0 %v366_v16, %s2160_s13  ;;  %v88_v13 = vrot.slane %v87_v3, 4  ;;  %v102_v16 = vrot.slane %v101_v11, 4 }
  0x23   :  { %332 = vrot.lane.b32.xlu1 %v329_v18, %s2159_s10  ;;  %v89_v20 = vadd.f32 %v88_v13, %v87_v3 }
  0x25   :  { %394 = vrot.lane.b32.xlu0 %v389_v19, %s2161_s16 }
  0x27   :  { %373 = vrot.lane.b32.xlu1 %v370_v21, %s2160_s13  ;;  %s2007_s13 = sshll.u32 %s2174_s12, 4  ;;  %s2008_s13 = int_to_ptr.vmem [resolvable:$true] %s2007_s13 }
  0x28   :  { %p2134_p6 = scmp.lt.s32.totalorder %s2008_s13, %s2008_s13 }
  0x29   :  { %417 = vrot.lane.b32.xlu0 %v412_v22, %s2162_s17 }
  0x2b   :  { %396 = vrot.lane.b32.xlu1 %v393_v23, %s2161_s16  ;;  %v103_v23 = vadd.f32 %v102_v16, %v101_v11  ;;  %s2166_s16 = smov 122  }
  0x2d   :  { %432 = vperm.xlu0 %2099, %v429_v24  }
  0x2f   :  { %419 = vrot.lane.b32.xlu1 %v416_v25, %s2162_s17 }
  0x31   :  { %518 = vperm.xlu0 %2099, %v2028_v26  }
  0x33   :  { %442 = vperm.xlu1 %2100, %v2025_v27   ;;  %v90_v27 = vrot.slane %v89_v20, 2 }
  0x35   :  { %546 = vperm.xlu0 %2099, %v2029_v28  }
  0x37   :  { %469 = vperm.xlu1 %2100, %v2026_v29  }
  0x39   :  { %574 = vperm.xlu0 %2099, %v2030_v30   ;;  %v104_v30 = vrot.slane %v103_v23, 2 }
  0x3b   :  { %496 = vperm.xlu1 %2100, %v2027_v31  }
  0x3d   :  { %627 = vperm.xlu0 %2099, %v2032_v32  }
  0x3f   :  { %617 = vperm.xlu1 %2100, %v2031_v33  }
  0x41   :  { %654 = vperm.xlu0 %2099, %v2033_v34  }
  0x43   :  { %703 = vperm.xlu1 %2100, %v2035_v35  }
  0x45   :  { %681 = vperm.xlu0 %2099, %v2034_v36   ;;  %v91_v36 = vadd.f32 %v90_v27, %v89_v20 }
  0x47   :  { %730 = vperm.xlu1 %2100, %v2036_v37  }
  0x49   :  { %800 = vperm.xlu0 %2099, %v2038_v38  }
  0x4b   :  { %757 = vperm.xlu1 %2100, %v2037_v39  }
  0x4d   :  { %993 = vperm.xlu0 %2099, %v2046_v40   ;;  %v82_v40 = vcombine.high %v50_v63, %v50_v63 }
  0x4f   :  { %810 = vperm.xlu1 %2100, %v2039_v41  }
  0x51   :  { %1020 = vperm.xlu0 %2099, %v2047_v42   ;;  %v105_v42 = vadd.f32 %v104_v30, %v103_v23 }
  0x53   :  { %837 = vperm.xlu1 %2100, %v2040_v43  }
  0x55   :  { %886 = vperm.xlu0 %2099, %v2042_v44  }
  0x57   :  { %864 = vperm.xlu1 %2100, %v2041_v45  }
  0x59   :  { %1203 = vperm.xlu0 %2099, %v2054_v46  }
  0x5b   :  { %1176 = vperm.xlu1 %2100, %v2053_v47   ;;  %v83_v47 = vcombine.high %v51_v6, %v51_v6 }
  0x5d   :  { %913 = vperm.xlu0 %2099, %v2043_v48  }
  0x5f   :  { %1047 = vperm.xlu1 %2100, %v2048_v49  }
  0x61   :  { %1230 = vperm.xlu0 %2099, %v2055_v50  }
  0x63   :  { %1359 = vperm.xlu1 %2100, %v2060_v51   ;;  %v92_v51 = vrot.slane %v91_v36, 1 }
  0x65   :  { %1542 = vperm.xlu0 %2099, %v2067_v52  }
  0x67   :  { %1069 = vperm.xlu1 %2100, %v2049_v53   ;;  %v94_v53 = vsel %vm86_vm0, %v82_v40, 0.0 }
  0x68   :  { %v95_v3 = vrot.slane %v94_v53, 4 }
  0x6b   :  { %1386 = vperm.xlu1 %2100, %v2061_v54  }
  0x6f   :  { %940 = vperm.xlu1 %2100, %v2044_v55   ;;  %v106_v55 = vrot.slane %v105_v42, 1 }
  0x89   :  { %v2355_v59 = vpop.permute.xlu1 %284 }
  0x8d   :  { %v2358_v61 = vpop.permute.xlu1 %286 }
  0x90   :  { %v57_v62 = vpop.permute.xlu0 %56 }
  0x91   :  { %v68_v0 = vrot.slane %v57_v62, %v67_v60  ;;  %v2366_v5 = vpop.permute.xlu1 %309  ;;  %v108_v62 = vsel %vm86_vm0, %v83_v47, 0.0 }
  0x93   :  { %v2363_v1 = vmul.f32 %v68_v0, %v50_v63 }
  0x94   :  { %v61_v2 = vpop.permute.xlu0 %60 }
  0x95   :  { %3531 = vst [vmem:[#allocation13_spill] sm:$0xff] %v2363_v1  ;;  %v75_v9 = vrot.slane %v61_v2, %v67_v60  ;;  %v121_v10 = vsel %vm86_vm0, %v2363_v1, 0.0  ;;  %v2380_v18 = vpop.permute.xlu1 %332  ;;  %v153_v25 = vsel %vm86_vm0, %v2363_v1, -inf  ;;  %v2389_v28 = vsub.f32 %v50_v63, %v2363_v1 }
  0x96   :  { %v122_v15 = vrot.slane %v121_v10, 4  ;;  %v154_v33 = vrot.slane %v153_v25, 4  ;;  %v2411_v58 = vcombine.high %v2363_v1, %v2363_v1  ;;  %v93_v2 = vadd.f32 %v92_v51, %v91_v36 }
  0x97   :  { %v2376_v14 = vmul.f32 %v75_v9, %v51_v6  ;;  %v189_v37 = vsel %vm86_vm0, %v2389_v28, -inf }
  0x98   :  { %v2374_v12 = vpop.permute.xlu0 %307  ;;  %v123_v22 = vadd.f32 %v122_v15, %v121_v10  ;;  %v155_v44 = vmax.f32 %v153_v25, %v154_v33  ;;  %v190_v46 = vrot.slane %v189_v37, 4  ;;  %v107_v10 = vadd.f32 %v106_v55, %v105_v42 }
  0x99   :  { %3532 = vst [vmem:[#allocation14_spill] sm:$0xff] %v2376_v14  ;;  %v135_v17 = vsel %vm86_vm0, %v2376_v14, 0.0  ;;  %v2391_v32 = vpop.permute.xlu1 %373  ;;  %v167_v34 = vsel %vm86_vm0, %v2376_v14, -inf  ;;  %v2400_v39 = vsub.f32 %v51_v6, %v2376_v14  ;;  %v2418_v11 = vcombine.high %v2376_v14, %v2376_v14 }
  0x9a   :  { %v136_v21 = vrot.slane %v135_v17, 4  ;;  %v124_v29 = vrot.slane %v123_v22, 2  ;;  %v168_v38 = vrot.slane %v167_v34, 4  ;;  %v156_v57 = vrot.slane %v155_v44, 2 }
  0x9b   :  { %v203_v45 = vsel %vm86_vm0, %v2400_v39, -inf  ;;  %v191_v60 = vmax.f32 %v189_v37, %v190_v46  ;;  %v128_v20 = vsel %vm86_vm0, %v2411_v58, 0.0 }
  0x9c   :  { %v2382_v19 = vpop.permute.xlu0 %330  ;;  %v137_v24 = vadd.f32 %v136_v21, %v135_v17  ;;  %v125_v41 = vadd.f32 %v124_v29, %v123_v22  ;;  %v204_v48 = vrot.slane %v203_v45, 4  ;;  %v169_v52 = vmax.f32 %v167_v34, %v168_v38 }
  0x9d   :  { %v2404_v49 = vpop.permute.xlu1 %396  ;;  %v157_v16 = vmax.f32 %v155_v44, %v156_v57  ;;  %v109_v17 = vrot.slane %v108_v62, 4  ;;  %v192_v21 = vrot.slane %v191_v60, 2  ;;  %v142_v29 = vsel %vm86_vm0, %v2418_v11, 0.0 }
  0x9e   :  { %v138_v31 = vrot.slane %v137_v24, 2  ;;  %v126_v54 = vrot.slane %v125_v41, 1  ;;  %v205_v63 = vmax.f32 %v203_v45, %v204_v48  ;;  %v170_v6 = vrot.slane %v169_v52, 2 }
  0x9f   :  { %v129_v34 = vrot.slane %v128_v20, 4  ;;  %v158_v36 = vrot.slane %v157_v16, 1  ;;  %v110_v37 = vadd.f32 %v109_v17, %v108_v62  ;;  %v2436_v38 = vmul.f32 0.0, %v2374_v12 }
  0xa0   :  { %v2386_v26 = vpop.permute.xlu0 %371  ;;  %v139_v43 = vadd.f32 %v138_v31, %v137_v24  ;;  %v127_v9 = vadd.f32 %v126_v54, %v125_v41  ;;  %v206_v22 = vrot.slane %v205_v63, 2  ;;  %v2426_v24 = vadd.f32 %v95_v3, %v94_v53 }
  0xa1   :  { %v2420_v15 = vpop.permute.xlu1 %419  ;;  %v171_v25 = vmax.f32 %v169_v52, %v170_v6  ;;  %v2431_v31 = vmul.f32 0.0, %v2391_v32  ;;  %v193_v40 = vmax.f32 %v191_v60, %v192_v21  ;;  %v2439_v42 = vmul.f32 0.0, %v2404_v49 }
  0xa2   :  { %v140_v56 = vrot.slane %v139_v43, 1  ;;  %v149_v27 = vsub.f32 %v93_v2, %v127_v9  ;;  %v207_v41 = vmax.f32 %v205_v63, %v206_v22  ;;  %v217_v45 = vmul.f32 0.5, %v127_v9 }
  0xa3   :  { %v143_v46 = vrot.slane %v142_v29, 4  ;;  %v172_v47 = vrot.slane %v171_v25, 1  ;;  %v194_v57 = vrot.slane %v193_v40, 1  ;;  %v2457_v62 = vmul.f32 0.0, %v2420_v15 }
  0xa4   :  { %v2395_v35 = vpop.permute.xlu0 %394  ;;  %v141_v13 = vadd.f32 %v140_v56, %v139_v43  ;;  %v221_v51 = vmul.f32 0.5, %v149_v27  ;;  %v2453_v56 = vmul.f32 0.0, %v2382_v19  ;;  %v208_v60 = vrot.slane %v207_v41, 1 }
  0xa5   :  { %v130_v2 = vadd.f32 %v129_v34, %v128_v20  ;;  %v159_v3 = vmax.f32 %v157_v16, %v158_v36  ;;  %v173_v6 = vmax.f32 %v171_v25, %v172_v47  ;;  %v97_v20 = vrot.slane %v2426_v24, 2 }
  0xa6   :  { %v151_v30 = vsub.f32 %v107_v10, %v141_v13  ;;  %v219_v52 = vmul.f32 0.5, %v141_v13  ;;  %v144_v10 = vadd.f32 %v143_v46, %v142_v29  ;;  %v111_v16 = vrot.slane %v110_v37, 2 }
  0xa7   :  { %v160_v25 = vsel %vm86_vm0, %v2411_v58, -inf  ;;  %v195_v27 = vmax.f32 %v193_v40, %v194_v57  ;;  %v209_v29 = vmax.f32 %v207_v41, %v208_v60  ;;  %v185_v34 = vcombine.high %v2389_v28, %v2389_v28 }
  0xa8   :  { %v2406_v50 = vpop.permute.xlu0 %417  ;;  %v223_v53 = vmul.f32 0.5, %v151_v30  ;;  %v230_v13 = vsel %vm229_vm1, %v219_v52, %v217_v45  ;;  %v186_v36 = vcombine.high %v2400_v39, %v2400_v39  ;;  %v131_v46 = vrot.slane %v130_v2, 2 }
  0xa9   :  { %v145_v47 = vrot.slane %v144_v10, 2  ;;  %v174_v58 = vsel %vm86_vm0, %v2418_v11, -inf  ;;  %v98_v41 = vadd.f32 %v97_v20, %v2426_v24  ;;  %v112_v39 = vadd.f32 %v111_v16, %v110_v37 }
  0xaa   :  { %v239_v17 = vsel %vm238_vm2, %v223_v53, %v221_v51  ;;  %v161_v53 = vrot.slane %v160_v25, 4  ;;  %v196_v11 = vsel %vm86_vm0, %v185_v34, -inf  ;;  %v210_v57 = vsel %vm86_vm0, %v186_v36, -inf }
  0xab   :  { %v262_v45 = vsel %vm261_vm4, %v230_v13, %v239_v17  ;;  %v132_v60 = vadd.f32 %v131_v46, %v130_v2  ;;  %v99_v13 = vrot.slane %v98_v41, 1  ;;  %v197_v17 = vrot.slane %v196_v11, 4 }
  0xac   :  { %v2414_v0 = vpop.permute.xlu0 %432  ;;  %v162_v20 = vmax.f32 %v160_v25, %v161_v53  ;;  %v113_v2 = vrot.slane %v112_v39, 1  ;;  %v312_v16 = vsel %vm311_vm7, %v2374_v12, %v2366_v5 }
  0xad   :  { %v100_v46 = vadd.f32 %v99_v13, %v98_v41 }
  0xb0   :  { %v2424_v23 = vpop.permute.xlu0 %518 }
  0xb1   :  { %v523_v43 = vmul.f32 %v2424_v23, %v2431_v31 }
  0xb2   :  { %v2433_v33 = vpop.permute.xlu1 %442 }
  0xb3   :  { %v445_v48 = vmul.f32 %v2433_v33, %v2436_v38  ;;  %531 = vrot.lane.b32.xlu1 %v523_v43, %s2164_s14  ;;  %v248_v43 = vsel %vm247_vm3, %v173_v6, %v159_v3  ;;  %v146_v3 = vadd.f32 %v145_v47, %v144_v10  ;;  %v163_v47 = vrot.slane %v162_v20, 2 }
  0xb4   :  { %v2443_v44 = vpop.permute.xlu0 %546  ;;  %v264_v51 = vsel %vm86_vm0, %v262_v45, %v248_v43  ;;  %v198_v43 = vmax.f32 %v196_v11, %v197_v17  ;;  %v2021_v11 = vld [vmem:[%s3509_s2 + $0x3] ss:$8 sm:$0x3]  ;;  %s2129_s2 = scalar_lea.vmem %s2008_s13, 256 }
  0xb5   :  { %v551_v55 = vmul.f32 %v2443_v44, %v2439_v42  ;;  %451 = vrot.lane.b32.xlu0 %v445_v48, %s2159_s10  ;;  %v257_v48 = vsel %vm256_vm5, %v209_v29, %v195_v27  ;;  %v133_v27 = vrot.slane %v132_v60, 1  ;;  %v147_v29 = vrot.slane %v146_v3, 1  ;;  %p2130_p5 = scmp.ne.s32.totalorder %s2008_s13, %s2129_s2  ;;  %p2135_p7 = scmp.lt.s32.totalorder %s2129_s2, %s2129_s2 }
  0xb6   :  { %v2448_v54 = vpop.permute.xlu1 %469  ;;  %v2502_v6 = vsel %vm266_vm6, %v264_v51, %v257_v48  ;;  %v114_v51 = vadd.f32 %v113_v2, %v112_v39  ;;  %v348_v13 = vrot.slane %v2021_v11, %v2225_v7 }
  0xb7   :  { %v472_v9 = vmul.f32 %v2448_v54, %v2453_v56  ;;  %559 = vrot.lane.b32.xlu1 %v551_v55, %s2165_s15  ;;  %v175_v55 = vrot.slane %v174_v58, 4  ;;  %v2511_v34 = vmul.f32 %v312_v16, %v2502_v6  ;;  %v134_v48 = vadd.f32 %v133_v27, %v132_v60  ;;  %p2136_p8 = por %p2135_p7, %p2134_p6 }
  0xb8   :  { %v2459_v63 = vpop.permute.xlu0 %574  ;;  %v148_v53 = vadd.f32 %v147_v29, %v146_v3  ;;  %v2537_v39 = vmul.f32 %v2386_v26, %v2502_v6  ;;  %v164_v3 = vmax.f32 %v162_v20, %v163_v47  ;;  %v2551_v47 = vmul.f32 %v348_v13, %v2502_v6 }
  0xb9   :  { %v579_v22 = vmul.f32 %v2459_v63, %v2457_v62  ;;  %478 = vrot.lane.b32.xlu0 %v472_v9, %s2158_s7  ;;  %v176_v10 = vmax.f32 %v174_v58, %v175_v55  ;;  %v446_v12 = vmul.f32 %v2433_v33, %v2511_v34  ;;  %v150_v17 = vsub.f32 %v100_v46, %v134_v48  ;;  %p2137_p9 = pnand %p2136_p8, %p2130_p5 }
  0xba   :  { %v2466_v21 = vpop.permute.xlu1 %496  ;;  %v165_v20 = vrot.slane %v164_v3, 1  ;;  %v2568_v13 = vmul.f32 %v2406_v50, %v2502_v6 }
  0xbb   :  { %587 = vrot.lane.b32.xlu1 %v579_v22, %s2166_s16  ;;  %v211_v22 = vrot.slane %v210_v57, 4  ;;  %v177_v58 = vrot.slane %v176_v10, 2  ;;  %v222_v46 = vmul.f32 0.5, %v150_v17 }
  0xbc   :  { %v2474_v30 = vpop.permute.xlu0 %627 }
  0xbd   :  { %v630_v28 = vmul.f32 %v2474_v30, %v2436_v38  ;;  %v212_v45 = vmax.f32 %v210_v57, %v211_v22  ;;  %v152_v22 = vsub.f32 %v114_v51, %v148_v53  ;;  %v2556_v51 = vmul.f32 %v2395_v35, %v2502_v6 }
  0xbe   :  { %v2485_v40 = vpop.permute.xlu1 %617  ;;  %v631_v17 = vmul.f32 %v2474_v30, %v2511_v34 }
  0xbf   :  { %636 = vrot.lane.b32.xlu1 %v630_v28, %s2159_s10  ;;  %v335_v28 = vsel %vm334_vm8, %v2382_v19, %v2380_v18  ;;  %v199_v19 = vrot.slane %v198_v43, 2 }
  0xc0   :  { %v2492_v52 = vpop.permute.xlu0 %654  ;;  %v2525_v55 = vmul.f32 %v335_v28, %v2502_v6  ;;  %v224_v28 = vmul.f32 0.5, %v152_v22 }
  0xc1   :  { %v657_v37 = vmul.f32 %v2492_v52, %v2453_v56  ;;  %v200_v27 = vmax.f32 %v198_v43, %v199_v19  ;;  %v499_v43 = vmul.f32 %v2466_v21, %v2551_v47  ;;  %v166_v19 = vmax.f32 %v164_v3, %v165_v20 }
  0xc2   :  { %v2497_v24 = vpop.permute.xlu1 %703  ;;  %v473_v60 = vmul.f32 %v2448_v54, %v2525_v55  ;;  %v577_v3 = vmul.f32 %v2459_v63, %v2568_v13 }
  0xc3   :  { %v708_v9 = vmul.f32 %v2497_v24, %v2431_v31  ;;  %663 = vrot.lane.b32.xlu1 %v657_v37, %s2158_s7  ;;  %v213_v37 = vrot.slane %v212_v45, 2 }
  0xc4   :  { %v682_v20 = vpop.permute.xlu0 %681 }
  0xc5   :  { %716 = vrot.lane.b32.xlu0 %v708_v9, %s2164_s14  ;;  %v178_v9 = vmax.f32 %v176_v10, %v177_v58  ;;  %v214_v29 = vmax.f32 %v212_v45, %v213_v37  ;;  %v218_v10 = vmul.f32 0.5, %v134_v48  ;;  %v220_v58 = vmul.f32 0.5, %v148_v53 }
  0xc6   :  { %v2514_v36 = vpop.permute.xlu1 %730  ;;  %v201_v45 = vrot.slane %v200_v27, 1 }
  0xc7   :  { %v735_v25 = vmul.f32 %v2514_v36, %v2439_v42  ;;  %453 = vrot.lane.b32.xlu1 %v446_v12, %s2159_s10  ;;  %v179_v12 = vrot.slane %v178_v9, 1  ;;  %v215_v48 = vrot.slane %v214_v29, 1  ;;  %v231_v53 = vsel %vm229_vm1, %v220_v58, %v218_v10 }
  0xc8   :  { %v202_v22 = vmax.f32 %v200_v27, %v201_v45  ;;  %v658_v10 = vmul.f32 %v2492_v52, %v2525_v55  ;;  %vm1729_vm1 = vcmask 916480  }
  0xc9   :  { %743 = vrot.lane.b32.xlu0 %v735_v25, %s2165_s15  ;;  %v521_v25 = vmul.f32 %v2424_v23, %v2537_v39  ;;  %v180_v37 = vmax.f32 %v178_v9, %v179_v12 }
  0xca   :  { %v2531_v41 = vpop.permute.xlu1 %757 }
  0xcb   :  { %v762_v57 = vmul.f32 %v2531_v41, %v2457_v62  ;;  %480 = vrot.lane.b32.xlu1 %v473_v60, %s2158_s7  ;;  %v240_v60 = vsel %vm238_vm2, %v224_v28, %v222_v46  ;;  %v249_v9 = vsel %vm247_vm3, %v180_v37, %v166_v19  ;;  %v352_v46 = vrot.slane %v2021_v11, %v2228_v8 }
  0xcc   :  { %v706_v28 = vmul.f32 %v2497_v24, %v2537_v39  ;;  %v733_v11 = vmul.f32 %v2514_v36, %v2556_v51  ;;  %v760_v19 = vmul.f32 %v2531_v41, %v2568_v13  ;;  %vm1750_vm2 = vcmask 785408  }
  0xcd   :  { %770 = vrot.lane.b32.xlu0 %v762_v57, %s2166_s16  ;;  %v549_v57 = vmul.f32 %v2443_v44, %v2556_v51  ;;  %vm1767_vm3 = vcmask 654336  }
  0xce   :  { %v2544_v2 = vpop.permute.xlu1 %810 }
  0xcf   :  { %v813_v16 = vmul.f32 %v2544_v2, %v2436_v38  ;;  %527 = vrot.lane.b32.xlu1 %v521_v25, %s2164_s14  ;;  %v263_v25 = vsel %vm261_vm4, %v231_v53, %v240_v60  ;;  %v376_v60 = vsel %vm375_vm9, %v2386_v26, %v2391_v32  ;;  %vm1787_vm4 = vcmask 523264  }
  0xd0   :  { %v265_v27 = vsel %vm86_vm0, %v263_v25, %v249_v9  ;;  %v2050_v25 = vld [vmem:[%s3510_s3 + $0xd0] sm:$0xff] }
  0xd1   :  { %819 = vrot.lane.b32.xlu0 %v813_v16, %s2159_s10  ;;  %v216_v16 = vmax.f32 %v214_v29, %v215_v48  ;;  %v684_v29 = vmul.f32 %v682_v20, %v2551_v47 }
  0xd3   :  { %555 = vrot.lane.b32.xlu1 %v549_v57, %s2165_s15  ;;  %v258_v12 = vsel %vm256_vm5, %v216_v16, %v202_v22  ;;  %vm1808_vm5 = vcmask 392192  }
  0xd4   :  { %v2588_v58 = vsel %vm266_vm6, %v265_v27, %v258_v12  ;;  %v2064_v12 = vld [vmem:[%s3510_s3 + $0x140] sm:$0xff]  ;;  %vm1829_vm6 = vcmask 261120  }
  0xd5   :  { %503 = vrot.lane.b32.xlu0 %v499_v43, %s2157_s6  ;;  %v814_v43 = vmul.f32 %v2544_v2, %v2511_v34  ;;  %v2596_v45 = vmul.f32 %v352_v46, %v2588_v58  ;;  %v2606_v57 = vmul.f32 %v2366_v5, %v2588_v58  ;;  %v2616_v53 = vmul.f32 %v2380_v18, %v2588_v58  ;;  %v2065_v46 = vld [vmem:[%s3510_s3 + $0x148] sm:$0xff] }
  0xd7   :  { %583 = vrot.lane.b32.xlu1 %v577_v3, %s2166_s16  ;;  %v500_v48 = vmul.f32 %v2466_v21, %v2596_v45  ;;  %v632_v37 = vmul.f32 %v2474_v30, %v2606_v57  ;;  %v447_v5 = vmul.f32 %v2433_v33, %v2606_v57  ;;  %v659_v21 = vmul.f32 %v2492_v52, %v2616_v53 }
  0xd8   :  { %v2627_v30 = vmul.f32 %v376_v60, %v2588_v58  ;;  %v474_v18 = vmul.f32 %v2448_v54, %v2616_v53  ;;  %v399_v52 = vsel %vm398_vm10, %v2395_v35, %v2404_v49  ;;  %v815_v16 = vmul.f32 %v2544_v2, %v2606_v57  ;;  %v2062_v2 = vld [vmem:[%s3510_s3 + $0x130] sm:$0xff] }
  0xd9   :  { %638 = vrot.lane.b32.xlu0 %v631_v17, %s2159_s10  ;;  %v2638_v26 = vmul.f32 %v399_v52, %v2588_v58  ;;  %v2668_v17 = vpop.permute.xlu0 %800  ;;  %v2070_v60 = vld [vmem:[%s3510_s3 + $0x170] sm:$0xff] }
  0xda   :  { %v707_v33 = vmul.f32 %v2497_v24, %v2627_v30  ;;  %v522_v32 = vmul.f32 %v2424_v23, %v2627_v30  ;;  %v422_v24 = vsel %vm421_vm11, %v2406_v50, %v2420_v15  ;;  %v2056_v50 = vld [vmem:[%s3510_s3 + $0x100] sm:$0xff]  ;;  %3533 = vst [vmem:[#allocation15_spill] sm:$0xff] %v2668_v17 }
  0xdb   :  { %688 = vrot.lane.b32.xlu1 %v684_v29, %s2157_s6  ;;  %v734_v54 = vmul.f32 %v2514_v36, %v2638_v26  ;;  %v2650_v35 = vmul.f32 %v422_v24, %v2588_v58  ;;  %v550_v49 = vmul.f32 %v2443_v44, %v2638_v26  ;;  %v2658_v36 = vpop.permute.xlu1 %837  ;;  %v685_v44 = vmul.f32 %v682_v20, %v2596_v45  ;;  %v2069_v20 = vld [vmem:[%s3510_s3 + $0x168] sm:$0xff]  ;;  %v2051_v29 = vld [vmem:[%s3510_s3 + $0xd8] sm:$0xff] }
  0xdc   :  { %v2045_v24 = vld [vmem:[%s3510_s3 + $0xa8] sm:$0xff] }
  0xdd   :  { %665 = vrot.lane.b32.xlu0 %v658_v10, %s2158_s7  ;;  %v761_v23 = vmul.f32 %v2531_v41, %v2650_v35  ;;  %v578_v15 = vmul.f32 %v2459_v63, %v2650_v35  ;;  %v2068_v41 = vld [vmem:[%s3510_s3 + $0x160] sm:$0xff]  ;;  %v2057_v63 = vld [vmem:[%s3510_s3 + $0x108] sm:$0xff]  ;;  %v2681_v3 = vpop.permute.xlu0 %993 }
  0xdf   :  { %821 = vrot.lane.b32.xlu1 %v814_v43, %s2159_s10  ;;  %v2673_v22 = vpop.permute.xlu1 %864 }
  0xe1   :  { %712 = vrot.lane.b32.xlu0 %v706_v28, %s2164_s14  ;;  %v2695_v10 = vpop.permute.xlu0 %1020 }
  0xe3   :  { %505 = vrot.lane.b32.xlu1 %v500_v48, %s2157_s6  ;;  %v2684_v9 = vpop.permute.xlu1 %1176  ;;  %v2072_v48 = vld [vmem:[%s3510_s3 + $0x180] sm:$0xff] }
  0xe5   :  { %739 = vrot.lane.b32.xlu0 %v733_v11, %s2165_s15  ;;  %v2708_v28 = vpop.permute.xlu0 %886  ;;  %v2063_v11 = vld [vmem:[%s3510_s3 + $0x138] sm:$0xff] }
  0xe7   :  { %640 = vrot.lane.b32.xlu1 %v632_v37, %s2159_s10  ;;  %v2700_v27 = vpop.permute.xlu1 %1047 }
  0xe9   :  { %766 = vrot.lane.b32.xlu0 %v760_v19, %s2166_s16  ;;  %v2058_v19 = vld [vmem:[%s3510_s3 + $0x110] sm:$0xff]  ;;  %v2721_v37 = vpop.permute.xlu0 %1203 }
  0xeb   :  { %667 = vrot.lane.b32.xlu1 %v659_v21, %s2158_s7  ;;  %v2710_v43 = vpop.permute.xlu1 %1359 }
  0xec   :  { %v1364_v14 = vmul.f32 %v2710_v43, %v2606_v57 }
  0xed   :  { %455 = vrot.lane.b32.xlu0 %v447_v5, %s2159_s10  ;;  %v2052_v5 = vld [vmem:[%s3510_s3 + $0xe0] sm:$0xff] }
  0xef   :  { %714 = vrot.lane.b32.xlu1 %v707_v33, %s2164_s14  ;;  %v2726_v21 = vpop.permute.xlu1 %1069  ;;  %v2734_v33 = vpop.permute.xlu0 %913 }
  0xf1   :  { %482 = vrot.lane.b32.xlu0 %v474_v18, %s2158_s7  ;;  %v2066_v18 = vld [vmem:[%s3510_s3 + $0x150] sm:$0xff] }
  0xf3   :  { %741 = vrot.lane.b32.xlu1 %v734_v54, %s2165_s15  ;;  %v2736_v52 = vpop.permute.xlu1 %1386  ;;  %v841_v54 = vmul.f32 %v2658_v36, %v2525_v55 }
  0xf4   :  { %v1389_v17 = vmul.f32 %v2736_v52, %v2453_v56 }
  0xf5   :  { %529 = vrot.lane.b32.xlu0 %v522_v32, %s2164_s14  ;;  %v2071_v32 = vld [vmem:[%s3510_s3 + $0x178] sm:$0xff] }
  0xf7   :  { %768 = vrot.lane.b32.xlu1 %v761_v23, %s2166_s16  ;;  %v996_v23 = vmul.f32 %v2681_v3, %v2436_v38 }
  0xf9   :  { %557 = vrot.lane.b32.xlu0 %v550_v49, %s2165_s15  ;;  %v2747_v49 = vpop.permute.xlu0 %1230 }
  0xfa   :  { %v1233_v1 = vmul.f32 %v2747_v49, %v2551_v47 }
  0xfb   :  { %1252 = vperm.xlu1 %2100, %v2056_v50   ;;  %v2751_v50 = vpop.permute.xlu1 %940 }
  0xfd   :  { %585 = vrot.lane.b32.xlu0 %v578_v15, %s2166_s16  ;;  %v2059_v15 = vld [vmem:[%s3510_s3 + $0x118] sm:$0xff]  ;;  %s2167_s3 = smov 112  }
  0xff   :  { %1569 = vperm.xlu1 %2100, %v2068_v41  }
 0x101   :  { %690 = vrot.lane.b32.xlu0 %v685_v44, %s2157_s6  ;;  %v998_v44 = vmul.f32 %v2681_v3, %v2606_v57 }
 0x103   :  { %1279 = vperm.xlu1 %2100, %v2057_v63   ;;  %v2761_v63 = vpop.permute.xlu0 %1542 }
 0x105   :  { %823 = vrot.lane.b32.xlu0 %v815_v16, %s2159_s10  ;;  %v840_v16 = vmul.f32 %v2658_v36, %v2453_v56 }
 0x107   :  { %1596 = vperm.xlu1 %2100, %v2069_v20  }
 0x109   :  { %1096 = vperm.xlu0 %2099, %v2050_v25   ;;  %v868_v25 = vmul.f32 %v2673_v22, %v2596_v45 }
 0x10b   :  { %1462 = vperm.xlu1 %2100, %v2064_v12   ;;  %v842_v12 = vmul.f32 %v2658_v36, %v2616_v53  ;;  %v867_v36 = vmul.f32 %v2673_v22, %v2551_v47  ;;  %v1025_v22 = vmul.f32 %v2695_v10, %v2616_v53 }
 0x10d   :  { %1413 = vperm.xlu0 %2099, %v2062_v2  }
 0x10f   :  { %1489 = vperm.xlu1 %2100, %v2065_v46  }
 0x111   :  { %1123 = vperm.xlu0 %2099, %v2051_v29   ;;  %v1024_v29 = vmul.f32 %v2695_v10, %v2525_v55 }
 0x113   :  { %1672 = vperm.xlu1 %2100, %v2072_v48  }
 0x115   :  { %1435 = vperm.xlu0 %2099, %v2063_v11   ;;  %v997_v11 = vmul.f32 %v2681_v3, %v2511_v34  ;;  %v1023_v3 = vmul.f32 %v2695_v10, %v2453_v56 }
 0x117   :  { %1166 = vperm.xlu1 %2100, %v2052_v5  }
 0x119   :  { %1306 = vperm.xlu0 %2099, %v2058_v19   ;;  %v1179_v19 = vmul.f32 %v2684_v9, %v2436_v38 }
 0x11b   :  { %1532 = vperm.xlu1 %2100, %v2066_v18   ;;  %v1181_v18 = vmul.f32 %v2684_v9, %v2606_v57 }
 0x11d   :  { %1618 = vperm.xlu0 %2099, %v2070_v60  }
 0x11f   :  { %848 = vrot.lane.b32.xlu1 %v841_v54, %s2158_s7 }
 0x121   :  { %1645 = vperm.xlu0 %2099, %v2071_v32  }
 0x123   :  { %1002 = vrot.lane.b32.xlu1 %v996_v23, %s2159_s10 }
 0x125   :  { %983 = vperm.xlu0 %2099, %v2045_v24   ;;  %v2759_v41 = vpop.permute.xlu1 %531  ;;  %v890_v24 = vmul.f32 %v2708_v28, %v2627_v30 }
 0x127   :  { %1006 = vrot.lane.b32.xlu1 %v998_v44, %s2159_s10  ;;  %v2770_v2 = vpop.permute.xlu0 %451  ;;  %v1050_v44 = vmul.f32 %v2700_v27, %v2551_v47 }
 0x129   :  { %1349 = vperm.xlu0 %2099, %v2059_v15   ;;  %v2768_v20 = vpop.permute.xlu1 %559 }
 0x12b   :  { %873 = vrot.lane.b32.xlu1 %v868_v25, %s2157_s6  ;;  %v2784_v48 = vpop.permute.xlu0 %478  ;;  %v1180_v25 = vmul.f32 %v2684_v9, %v2511_v34 }
 0x12d   :  { %846 = vrot.lane.b32.xlu0 %v840_v16, %s2158_s7  ;;  %v2778_v46 = vpop.permute.xlu1 %587 }
 0x12f   :  { %1031 = vrot.lane.b32.xlu1 %v1024_v29, %s2158_s7  ;;  %v1206_v29 = vmul.f32 %v2721_v37, %v2453_v56 }
 0x131   :  { %850 = vrot.lane.b32.xlu0 %v842_v12, %s2158_s7  ;;  %v637_v5 = vpop.permute.xlu1 %636 }
 0x133   :  { %1185 = vrot.lane.b32.xlu1 %v1179_v19, %s2159_s10 }
 0x135   :  { %1004 = vrot.lane.b32.xlu0 %v997_v11, %s2159_s10  ;;  %v664_v32 = vpop.permute.xlu1 %663  ;;  %v889_v11 = vmul.f32 %v2708_v28, %v2537_v39 }
 0x137   :  { %v2792_v60 = vpop.permute.xlu0 %716  ;;  %1189 = vrot.lane.b32.xlu1 %v1181_v18, %s2159_s10  ;;  %v891_v18 = vmul.f32 %v2708_v28, %v2431_v31 }
 0x139   :  { %871 = vrot.lane.b32.xlu0 %v867_v36, %s2157_s6  ;;  %v2804_v23 = vpop.permute.xlu1 %453  ;;  %v1208_v36 = vmul.f32 %v2721_v37, %v2616_v53 }
 0x13b   :  { %v2800_v54 = vpop.permute.xlu0 %743  ;;  %897 = vrot.lane.b32.xlu1 %v890_v24, %s2164_s14  ;;  %v1363_v24 = vmul.f32 %v2710_v43, %v2511_v34 }
 0x13d   :  { %1029 = vrot.lane.b32.xlu0 %v1023_v3, %s2158_s7  ;;  %v2814_v16 = vpop.permute.xlu1 %480 }
 0x13f   :  { %v2810_v15 = vpop.permute.xlu0 %770  ;;  %1054 = vrot.lane.b32.xlu1 %v1050_v44, %s2157_s6  ;;  %v1051_v44 = vmul.f32 %v2700_v27, %v2596_v45 }
 0x141   :  { %1033 = vrot.lane.b32.xlu0 %v1025_v22, %s2158_s7  ;;  %v2824_v10 = vpop.permute.xlu1 %527 }
 0x143   :  { %v2820_v12 = vpop.permute.xlu0 %819  ;;  %1212 = vrot.lane.b32.xlu1 %v1206_v29, %s2158_s7  ;;  %v916_v29 = vmul.f32 %v2734_v33, %v2556_v51 }
 0x144   :  { %3534 = vst [vmem:[#allocation16_spill] sm:$0xff] %v2820_v12 }
 0x145   :  { %1187 = vrot.lane.b32.xlu0 %v1180_v25, %s2159_s10  ;;  %v2834_v9 = vpop.permute.xlu1 %555 }
 0x147   :  { %v2830_v19 = vpop.permute.xlu0 %503  ;;  %1216 = vrot.lane.b32.xlu1 %v1208_v36, %s2158_s7 }
 0x149   :  { %895 = vrot.lane.b32.xlu0 %v889_v11, %s2164_s14  ;;  %v2844_v22 = vpop.permute.xlu1 %583  ;;  %v1207_v11 = vmul.f32 %v2721_v37, %v2525_v55 }
 0x14b   :  { %v2840_v3 = vpop.permute.xlu0 %638  ;;  %1370 = vrot.lane.b32.xlu1 %v1363_v24, %s2159_s10  ;;  %v1362_v24 = vmul.f32 %v2710_v43, %v2436_v38  ;;  %v917_v43 = vmul.f32 %v2734_v33, %v2638_v26 }
 0x14c   :  { %v642_v8 = vsel %vm334_vm8, %v637_v5, %v2840_v3  ;;  %v1072_v5 = vmul.f32 %v2726_v21, %v2537_v39 }
 0x14d   :  { %899 = vrot.lane.b32.xlu0 %v891_v18, %s2164_s14  ;;  %v2854_v28 = vpop.permute.xlu1 %688  ;;  %v918_v18 = vmul.f32 %v2734_v33, %v2439_v42  ;;  %v1391_v33 = vmul.f32 %v2736_v52, %v2616_v53 }
 0x14f   :  { %v2850_v25 = vpop.permute.xlu0 %665  ;;  %922 = vrot.lane.b32.xlu1 %v916_v29, %s2165_s15  ;;  %v1073_v29 = vmul.f32 %v2726_v21, %v2627_v30 }
 0x150   :  { %v669_v7 = vsel %vm311_vm7, %v664_v32, %v2850_v25 }
 0x151   :  { %1056 = vrot.lane.b32.xlu0 %v1051_v44, %s2157_s6  ;;  %v2864_v27 = vpop.permute.xlu1 %821 }
 0x152   :  { %3535 = vst [vmem:[#allocation17_spill] sm:$0xff] %v2864_v27 }
 0x153   :  { %v2860_v36 = vpop.permute.xlu0 %712  ;;  %926 = vrot.lane.b32.xlu1 %v918_v18, %s2165_s15  ;;  %v2883_v18 = vmul.f32 0.0, %v2355_v59 }
 0x155   :  { %1214 = vrot.lane.b32.xlu0 %v1207_v11, %s2158_s7  ;;  %v2874_v37 = vpop.permute.xlu1 %505  ;;  %3536 = vst [vmem:[#allocation18_spill] sm:$0xff] %v2883_v18 }
 0x157   :  { %v2870_v44 = vpop.permute.xlu0 %739  ;;  %1080 = vrot.lane.b32.xlu1 %v1073_v29, %s2164_s14 }
 0x159   :  { %1368 = vrot.lane.b32.xlu0 %v1362_v24, %s2159_s10  ;;  %v620_v24 = vmul.f32 %v2485_v40, %v2883_v18  ;;  %v641_v29 = vpop.permute.xlu1 %640 }
 0x15b   :  { %v2880_v11 = vpop.permute.xlu0 %766  ;;  %1237 = vrot.lane.b32.xlu1 %v1233_v1, %s2157_s6  ;;  %v647_v12 = vadd.f32 %v642_v8, %v620_v24  ;;  %v457_v8 = vsel %vm334_vm8, %v2770_v2, %v2804_v23  ;;  %v1546_v24 = vmul.f32 %v2761_v63, %v2511_v34  ;;  %v2933_v34 = vmul.f32 %v2358_v61, %v2588_v58 }
 0x15d   :  { %1372 = vrot.lane.b32.xlu0 %v1364_v14, %s2159_s10  ;;  %v674_v14 = vadd.f32 %v669_v7, %v647_v12  ;;  %v668_v27 = vpop.permute.xlu1 %667  ;;  %v1074_v7 = vmul.f32 %v2726_v21, %v2431_v31  ;;  %v435_v12 = vmul.f32 %v2414_v0, %v2883_v18  ;;  %v484_v21 = vsel %vm311_vm7, %v2784_v48, %v2814_v16 }
 0x15e   :  { %3537 = vst [vmem:[#allocation19_spill] sm:$0xff] %v2933_v34  ;;  %v943_v48 = vmul.f32 %v2751_v50, %v2568_v13  ;;  %v622_v58 = vmul.f32 %v2485_v40, %v2933_v34 }
 0x15f   :  { %v456_v4 = vpop.permute.xlu0 %455  ;;  %1395 = vrot.lane.b32.xlu1 %v1389_v17, %s2158_s7  ;;  %v696_v32 = vadd.f32 %v2854_v28, %v674_v14  ;;  %v462_v14 = vadd.f32 %v457_v8, %v435_v12 }
 0x161   :  { %924 = vrot.lane.b32.xlu0 %v917_v43, %s2165_s15  ;;  %v289_v43 = vsel %vm288_vm12, %v2355_v59, %v2358_v61  ;;  %v1234_v59 = vmul.f32 %v2747_v49, %v2596_v45  ;;  %v1390_v49 = vmul.f32 %v2736_v52, %v2525_v55  ;;  %v670_v52 = vsel %vm311_vm7, %v2850_v25, %v668_v27 }
 0x162   :  { %v2927_v2 = vmul.f32 %v289_v43, %v2502_v6  ;;  %v458_v6 = vsel %vm334_vm8, %v2804_v23, %v456_v4  ;;  %v437_v23 = vmul.f32 %v2414_v0, %v2933_v34  ;;  %v643_v43 = vsel %vm334_vm8, %v2840_v3, %v641_v29 }
 0x163   :  { %v483_v1 = vpop.permute.xlu0 %482  ;;  %1399 = vrot.lane.b32.xlu1 %v1391_v33, %s2158_s7  ;;  %v715_v33 = vpop.permute.xlu1 %714  ;;  %v1545_v3 = vmul.f32 %v2761_v63, %v2436_v38  ;;  %v507_v25 = vsel %vm288_vm12, %v2830_v19, %v2874_v37 }
 0x164   :  { %v485_v12 = vsel %vm311_vm7, %v2814_v16, %v483_v1 }
 0x165   :  { %1078 = vrot.lane.b32.xlu0 %v1072_v5, %s2164_s14  ;;  %v723_v5 = vadd.f32 %v2860_v36, %v696_v32  ;;  %v436_v32 = vmul.f32 %v2414_v0, %v2927_v2 }
 0x167   :  { %v2913_v17 = vpop.permute.xlu0 %529  ;;  %1553 = vrot.lane.b32.xlu1 %v1546_v24, %s2159_s10  ;;  %v750_v61 = vadd.f32 %v2870_v44, %v723_v5  ;;  %v463_v5 = vadd.f32 %v458_v6, %v436_v32 }
 0x169   :  { %1082 = vrot.lane.b32.xlu0 %v1074_v7, %s2164_s14  ;;  %v489_v7 = vadd.f32 %v484_v21, %v462_v14  ;;  %v649_v21 = vadd.f32 %v641_v29, %v622_v58  ;;  %v777_v14 = vadd.f32 %v2880_v11, %v750_v61  ;;  %v490_v34 = vadd.f32 %v485_v12, %v463_v5 }
 0x16a   :  { %v719_v61 = vsel %vm533_vm13, %v715_v33, %v2792_v60  ;;  %v535_v60 = vsel %vm533_vm13, %v2913_v17, %v2759_v41 }
 0x16b   :  { %v558_v18 = vpop.permute.xlu0 %557  ;;  %v511_v8 = vadd.f32 %v2830_v19, %v489_v7  ;;  %949 = vrot.lane.b32.xlu1 %v943_v48, %s2166_s16  ;;  %v621_v48 = vmul.f32 %v2485_v40, %v2927_v2  ;;  %v464_v7 = vadd.f32 %v456_v4, %v437_v23  ;;  %v676_v16 = vadd.f32 %v668_v27, %v649_v21 }
 0x16c   :  { %v562_v12 = vsel %vm561_vm14, %v2834_v9, %v558_v18 }
 0x16d   :  { %1239 = vrot.lane.b32.xlu0 %v1234_v59, %s2157_s6  ;;  %v742_v59 = vpop.permute.xlu1 %741  ;;  %v539_v0 = vadd.f32 %v2824_v10, %v511_v8  ;;  %v648_v29 = vadd.f32 %v643_v43, %v621_v48  ;;  %v491_v6 = vadd.f32 %v483_v1, %v464_v7  ;;  %v1547_v8 = vmul.f32 %v2761_v63, %v2606_v57 }
 0x16e   :  { %v512_v1 = vadd.f32 %v507_v25, %v490_v34  ;;  %v746_v57 = vsel %vm561_vm14, %v742_v59, %v2800_v54  ;;  %v534_v63 = vsel %vm533_vm13, %v2824_v10, %v2913_v17  ;;  %v718_v54 = vsel %vm533_vm13, %v2860_v36, %v715_v33 }
 0x16f   :  { %v586_v24 = vpop.permute.xlu0 %585  ;;  %783 = vrot.lane.b32.xlu1 %v777_v14, %s2162_s17  ;;  %v675_v27 = vadd.f32 %v670_v52, %v648_v29  ;;  %v567_v38 = vadd.f32 %v2834_v9, %v539_v0  ;;  %v563_v10 = vsel %vm561_vm14, %v558_v18, %v2768_v20  ;;  %v745_v20 = vsel %vm561_vm14, %v2870_v44, %v742_v59 }
 0x170   :  { %v590_v17 = vsel %vm589_vm15, %v2844_v22, %v586_v24  ;;  %v591_v9 = vsel %vm589_vm15, %v586_v24, %v2778_v46  ;;  %v945_v46 = vmul.f32 %v2751_v50, %v2457_v62  ;;  %v944_v59 = vmul.f32 %v2751_v50, %v2650_v35 }
 0x171   :  { %1397 = vrot.lane.b32.xlu0 %v1390_v49, %s2158_s7  ;;  %v769_v58 = vpop.permute.xlu1 %768  ;;  %v513_v49 = vadd.f32 %v2874_v37, %v491_v6  ;;  %v540_v37 = vadd.f32 %v534_v63, %v512_v1  ;;  %v595_v21 = vadd.f32 %v2844_v22, %v567_v38 }
 0x172   :  { %v773_v34 = vsel %vm589_vm15, %v769_v58, %v2810_v15  ;;  %v772_v24 = vsel %vm589_vm15, %v2880_v11, %v769_v58 }
 0x173   :  { %v691_v32 = vpop.permute.xlu0 %690  ;;  %v541_v41 = vadd.f32 %v535_v60, %v513_v49  ;;  %v568_v14 = vadd.f32 %v562_v12, %v540_v37 }
 0x174   :  { %v692_v4 = vsel %vm288_vm12, %v2854_v28, %v691_v32  ;;  %v698_v40 = vadd.f32 %v691_v32, %v676_v16 }
 0x175   :  { %1551 = vrot.lane.b32.xlu0 %v1545_v3, %s2159_s10  ;;  %v697_v19 = vadd.f32 %v692_v4, %v675_v27  ;;  %v569_v5 = vadd.f32 %v563_v10, %v541_v41  ;;  %v596_v18 = vadd.f32 %v590_v17, %v568_v14 }
 0x176   :  { %v725_v28 = vadd.f32 %v719_v61, %v698_v40 }
 0x177   :  { %v724_v15 = vadd.f32 %v718_v54, %v697_v19  ;;  %v597_v33 = vadd.f32 %v591_v9, %v569_v5  ;;  %v3011_v0 = vpop.permute.xlu0 %823 }
 0x178   :  { %v752_v23 = vadd.f32 %v746_v57, %v725_v28 }
 0x179   :  { %1555 = vrot.lane.b32.xlu0 %v1547_v8, %s2159_s10  ;;  %v751_v48 = vadd.f32 %v745_v20, %v724_v15  ;;  %s2171_s10 = smov 64  }
 0x17a   :  { %v779_v43 = vadd.f32 %v773_v34, %v752_v23  ;;  %v1253_v36 = vpop.permute.xlu1 %1252 }
 0x17b   :  { %v778_v7 = vadd.f32 %v772_v24, %v751_v48  ;;  %v1255_v6 = vmul.f32 %v1253_v36, %v2537_v39  ;;  %v1257_v40 = vmul.f32 %v1253_v36, %v2431_v31  ;;  %v1256_v25 = vmul.f32 %v1253_v36, %v2627_v30 }
 0x17c   :  { %787 = vrot.lane.b32.xlu1 %v779_v43, %s2162_s17 }
 0x17d   :  { %601 = vrot.lane.b32.xlu0 %v595_v21, %s2162_s17 }
 0x17e   :  { %v1570_v22 = vpop.permute.xlu1 %1569 }
 0x17f   :  { %v1573_v28 = vmul.f32 %v1570_v22, %v2525_v55  ;;  %v1572_v57 = vmul.f32 %v1570_v22, %v2453_v56  ;;  %v1574_v23 = vmul.f32 %v1570_v22, %v2616_v53 }
 0x180   :  { %603 = vrot.lane.b32.xlu1 %v596_v18, %s2162_s17 }
 0x181   :  { %605 = vrot.lane.b32.xlu0 %v597_v33, %s2162_s17 }
 0x182   :  { %v1280_v44 = vpop.permute.xlu1 %1279 }
 0x183   :  { %v1283_v37 = vmul.f32 %v1280_v44, %v2638_v26  ;;  %v1282_v53 = vmul.f32 %v1280_v44, %v2556_v51  ;;  %v1284_v17 = vmul.f32 %v1280_v44, %v2439_v42 }
 0x184   :  { %953 = vrot.lane.b32.xlu1 %v945_v46, %s2166_s16 }
 0x185   :  { %785 = vrot.lane.b32.xlu0 %v778_v7, %s2162_s17 }
 0x186   :  { %v3017_v16 = vpop.permute.xlu1 %1596 }
 0x187   :  { %v1600_v20 = vmul.f32 %v3017_v16, %v2596_v45  ;;  %v1599_v33 = vmul.f32 %v3017_v16, %v2551_v47 }
 0x188   :  { %v1097_v52 = vpop.permute.xlu0 %1096 }
 0x189   :  { %v1100_v3 = vmul.f32 %v1097_v52, %v2638_v26  ;;  %951 = vrot.lane.b32.xlu0 %v944_v59, %s2166_s16  ;;  %v1099_v11 = vmul.f32 %v1097_v52, %v2556_v51  ;;  %v1101_v50 = vmul.f32 %v1097_v52, %v2439_v42 }
 0x18a   :  { %v3024_v32 = vpop.permute.xlu1 %1462 }
 0x18b   :  { %1107 = vrot.lane.b32.xlu1 %v1100_v3, %s2165_s15  ;;  %v1465_v7 = vmul.f32 %v3024_v32, %v2556_v51  ;;  %v1467_v52 = vmul.f32 %v3024_v32, %v2439_v42  ;;  %v1466_v3 = vmul.f32 %v3024_v32, %v2638_v26 }
 0x18c   :  { %v1414_v29 = vpop.permute.xlu0 %1413 }
 0x18d   :  { %1105 = vrot.lane.b32.xlu0 %v1099_v11, %s2165_s15  ;;  %v1417_v61 = vmul.f32 %v1414_v29, %v2596_v45  ;;  %v1416_v1 = vmul.f32 %v1414_v29, %v2551_v47 }
 0x18e   :  { %v3030_v8 = vpop.permute.xlu1 %1489 }
 0x18f   :  { %1261 = vrot.lane.b32.xlu1 %v1255_v6, %s2164_s14  ;;  %v1492_v32 = vmul.f32 %v3030_v8, %v2568_v13 }
 0x190   :  { %v1124_v4 = vpop.permute.xlu0 %1123 }
 0x191   :  { %1109 = vrot.lane.b32.xlu0 %v1101_v50, %s2165_s15  ;;  %v1126_v19 = vmul.f32 %v1124_v4, %v2568_v13  ;;  %v1128_v34 = vmul.f32 %v1124_v4, %v2457_v62  ;;  %v1127_v56 = vmul.f32 %v1124_v4, %v2650_v35 }
 0x192   :  { %v3036_v38 = vpop.permute.xlu1 %1672 }
 0x193   :  { %1265 = vrot.lane.b32.xlu1 %v1257_v40, %s2164_s14 }
 0x194   :  { %v1436_v27 = vpop.permute.xlu0 %1435 }
 0x195   :  { %1263 = vrot.lane.b32.xlu0 %v1256_v25, %s2164_s14  ;;  %v1438_v21 = vmul.f32 %v1436_v27, %v2537_v39  ;;  %v1440_v14 = vmul.f32 %v1436_v27, %v2431_v31  ;;  %v1439_v5 = vmul.f32 %v1436_v27, %v2627_v30 }
 0x196   :  { %v3042_v49 = vpop.permute.xlu1 %1166 }
 0x197   :  { %1422 = vrot.lane.b32.xlu1 %v1417_v61, %s2157_s6  ;;  %v1493_v61 = vmul.f32 %v3030_v8, %v2650_v35 }
 0x198   :  { %v1307_v58 = vpop.permute.xlu0 %1306 }
 0x199   :  { %1420 = vrot.lane.b32.xlu0 %v1416_v1, %s2157_s6  ;;  %v1310_v22 = vmul.f32 %v1307_v58, %v2650_v35  ;;  %v1309_v24 = vmul.f32 %v1307_v58, %v2568_v13  ;;  %v1311_v44 = vmul.f32 %v1307_v58, %v2457_v62 }
 0x19a   :  { %v3050_v60 = vpop.permute.xlu1 %1532 }
 0x19b   :  { %1580 = vrot.lane.b32.xlu1 %v1573_v28, %s2158_s7 }
 0x19c   :  { %v3047_v63 = vpop.permute.xlu0 %1618 }
 0x19d   :  { %1578 = vrot.lane.b32.xlu0 %v1572_v57, %s2158_s7  ;;  %v1622_v29 = vmul.f32 %v3047_v63, %v2627_v30  ;;  %v1621_v50 = vmul.f32 %v3047_v63, %v2537_v39  ;;  %v1623_v30 = vmul.f32 %v3047_v63, %v2431_v31  ;;  %v1494_v39 = vmul.f32 %v3030_v8, %v2457_v62 }
 0x19e   :  { %v3058_v12 = vpop.permute.xlu1 %848  ;;  %v1675_v8 = vmul.f32 %v3036_v38, %v2568_v13  ;;  %v1676_v13 = vmul.f32 %v3036_v38, %v2650_v35  ;;  %v3541_v35 = vld [vmem:[#allocation15_spill] sm:$0xff] }
 0x19f   :  { %1132 = vrot.lane.b32.xlu1 %v1126_v19, %s2166_s16 }
 0x1a0   :  { %v3055_v55 = vpop.permute.xlu0 %1645 }
 0x1a1   :  { %1582 = vrot.lane.b32.xlu0 %v1574_v23, %s2158_s7  ;;  %v1649_v31 = vmul.f32 %v3055_v55, %v2638_v26  ;;  %v1648_v28 = vmul.f32 %v3055_v55, %v2556_v51  ;;  %v1650_v26 = vmul.f32 %v3055_v55, %v2439_v42  ;;  %v1677_v51 = vmul.f32 %v3036_v38, %v2457_v62  ;;  %v3538_v62 = vld [vmem:[#allocation17_spill] sm:$0xff]  ;;  %s2170_s7 = smov 80  }
 0x1a2   :  { %v3066_v10 = vpop.permute.xlu1 %1002 }
 0x1a3   :  { %1136 = vrot.lane.b32.xlu1 %v1128_v34, %s2166_s16 }
 0x1a4   :  { %v3063_v54 = vpop.permute.xlu0 %983 }
 0x1a5   :  { %1134 = vrot.lane.b32.xlu0 %v1127_v56, %s2166_s16 }
 0x1a6   :  { %v3074_v41 = vpop.permute.xlu1 %1006 }
 0x1a7   :  { %1290 = vrot.lane.b32.xlu1 %v1283_v37, %s2165_s15 }
 0x1a8   :  { %v3071_v43 = vpop.permute.xlu0 %1349 }
 0x1a9   :  { %1288 = vrot.lane.b32.xlu0 %v1282_v53, %s2165_s15  ;;  %v3539_v53 = vld [vmem:[#allocation16_spill] sm:$0xff] }
 0x1aa   :  { %v3082_v9 = vpop.permute.xlu1 %873 }
 0x1ab   :  { %1444 = vrot.lane.b32.xlu1 %v1438_v21, %s2164_s14  ;;  %v825_v21 = vsel %vm334_vm8, %v3539_v53, %v3538_v62 }
 0x1ac   :  { %v3079_v15 = vpop.permute.xlu0 %846 }
 0x1ad   :  { %1292 = vrot.lane.b32.xlu0 %v1284_v17, %s2165_s15 }
 0x1ae   :  { %v3091_v18 = vpop.permute.xlu1 %1031 }
 0x1af   :  { %1448 = vrot.lane.b32.xlu1 %v1440_v14, %s2164_s14  ;;  %v3540_v14 = vld [vmem:[#allocation18_spill] sm:$0xff] }
 0x1b0   :  { %v3087_v36 = vpop.permute.xlu0 %850  ;;  %v803_v38 = vmul.f32 %v3541_v35, %v3540_v14 }
 0x1b1   :  { %1446 = vrot.lane.b32.xlu0 %v1439_v5, %s2164_s14  ;;  %v852_v5 = vsel %vm311_vm7, %v3079_v15, %v3058_v12 }
 0x1b2   :  { %v3100_v46 = vpop.permute.xlu1 %1185 }
 0x1b3   :  { %1605 = vrot.lane.b32.xlu1 %v1600_v20, %s2157_s6  ;;  %v830_v20 = vadd.f32 %v825_v21, %v803_v38  ;;  %v3543_v38 = vld [vmem:[#allocation19_spill] sm:$0xff] }
 0x1b4   :  { %v3097_v48 = vpop.permute.xlu0 %1004 }
 0x1b5   :  { %1603 = vrot.lane.b32.xlu0 %v1599_v33, %s2157_s6  ;;  %s2169_s6 = smov 96  }
 0x1b6   :  { %v3109_v47 = vpop.permute.xlu1 %1189 }
 0x1b7   :  { %1317 = vrot.lane.b32.xlu1 %v1310_v22, %s2166_s16 }
 0x1b8   :  { %v3105_v45 = vpop.permute.xlu0 %871 }
 0x1b9   :  { %1315 = vrot.lane.b32.xlu0 %v1309_v24, %s2166_s16  ;;  %v857_v24 = vadd.f32 %v852_v5, %v830_v20  ;;  %v826_v20 = vsel %vm334_vm8, %v3538_v62, %v3011_v0  ;;  %v875_v62 = vsel %vm288_vm12, %v3105_v45, %v3082_v9 }
 0x1ba   :  { %v3118_v16 = vpop.permute.xlu1 %897 }
 0x1bb   :  { %1471 = vrot.lane.b32.xlu1 %v1465_v7, %s2165_s15  ;;  %v879_v7 = vadd.f32 %v3105_v45, %v857_v24 }
 0x1bc   :  { %v3114_v59 = vpop.permute.xlu0 %1029 }
 0x1bd   :  { %1319 = vrot.lane.b32.xlu0 %v1311_v44, %s2166_s16 }
 0x1be   :  { %v3128_v6 = vpop.permute.xlu1 %1054 }
 0x1bf   :  { %1475 = vrot.lane.b32.xlu1 %v1467_v52, %s2165_s15 }
 0x1c0   :  { %v3124_v11 = vpop.permute.xlu0 %1033 }
 0x1c1   :  { %1473 = vrot.lane.b32.xlu0 %v1466_v3, %s2165_s15 }
 0x1c2   :  { %v3138_v40 = vpop.permute.xlu1 %1212 }
 0x1c3   :  { %1629 = vrot.lane.b32.xlu1 %v1622_v29, %s2164_s14 }
 0x1c4   :  { %v3134_v4 = vpop.permute.xlu0 %1187 }
 0x1c5   :  { %1627 = vrot.lane.b32.xlu0 %v1621_v50, %s2164_s14 }
 0x1c6   :  { %v3148_v27 = vpop.permute.xlu1 %1216 }
 0x1c7   :  { %1498 = vrot.lane.b32.xlu1 %v1492_v32, %s2166_s16 }
 0x1c8   :  { %v3144_v25 = vpop.permute.xlu0 %895 }
 0x1c9   :  { %1631 = vrot.lane.b32.xlu0 %v1623_v30, %s2164_s14  ;;  %v906_v3 = vadd.f32 %v3144_v25, %v879_v7  ;;  %s2173_s14 = smov 32  }
 0x1ca   :  { %v3158_v58 = vpop.permute.xlu1 %1370 }
 0x1cb   :  { %1502 = vrot.lane.b32.xlu1 %v1494_v39, %s2166_s16 }
 0x1cc   :  { %v3154_v1 = vpop.permute.xlu0 %899 }
 0x1cd   :  { %1500 = vrot.lane.b32.xlu0 %v1493_v61, %s2166_s16 }
 0x1ce   :  { %v3168_v63 = vpop.permute.xlu1 %922 }
 0x1cf   :  { %1656 = vrot.lane.b32.xlu1 %v1649_v31, %s2165_s15  ;;  %v933_v29 = vadd.f32 %v3168_v63, %v906_v3  ;;  %v804_v3 = vmul.f32 %v3541_v35, %v2927_v2 }
 0x1d0   :  { %v3164_v57 = vpop.permute.xlu0 %1056 }
 0x1d1   :  { %1654 = vrot.lane.b32.xlu0 %v1648_v28, %s2165_s15 }
 0x1d2   :  { %v927_v23 = vpop.permute.xlu1 %926 }
 0x1d3   :  { %1681 = vrot.lane.b32.xlu1 %v1675_v8, %s2166_s16 }
 0x1d4   :  { %v3174_v19 = vpop.permute.xlu0 %1214 }
 0x1d5   :  { %1658 = vrot.lane.b32.xlu0 %v1650_v26, %s2165_s15  ;;  %s1850_s15 = sld [smem:[#allocation4]] }
 0x1d6   :  { %v3184_v56 = vpop.permute.xlu1 %1080 }
 0x1d7   :  { %1685 = vrot.lane.b32.xlu1 %v1677_v51, %s2166_s16 }
 0x1d8   :  { %v3182_v34 = vpop.permute.xlu0 %1368 }
 0x1d9   :  { %1683 = vrot.lane.b32.xlu0 %v1676_v13, %s2166_s16  ;;  %s2073_s16 = sld [smem:[#allocation4 + $0x1]] }
 0x1da   :  { %v3189_v55 = vpop.permute.xlu1 %1237 }
 0x1dc   :  { %v3187_v42 = vpop.permute.xlu0 %1372 }
 0x1de   :  { %v1396_v17 = vpop.permute.xlu1 %1395 }
 0x1e0   :  { %v925_v37 = vpop.permute.xlu0 %924 }
 0x1e1   :  { %v928_v45 = vsel %vm561_vm14, %v3168_v63, %v925_v37 }
 0x1e2   :  { %v3201_v22 = vpop.permute.xlu1 %1399 }
 0x1e4   :  { %v3199_v33 = vpop.permute.xlu0 %1078 }
 0x1e6   :  { %v1554_v52 = vpop.permute.xlu1 %1553 }
 0x1e8   :  { %v3204_v44 = vpop.permute.xlu0 %1082 }
 0x1ea   :  { %v950_v32 = vpop.permute.xlu1 %949 }
 0x1eb   :  { %v960_v30 = vadd.f32 %v950_v32, %v933_v29 }
 0x1ec   :  { %v3208_v50 = vpop.permute.xlu0 %1239 }
 0x1ed   :  { %v3213_v15 = vsel %vm288_vm12, %v3189_v55, %v3208_v50  ;;  %966 = vrot.lane.b32.xlu0 %v960_v30, %s2162_s17  ;;  %v831_v30 = vadd.f32 %v826_v20, %v804_v3  ;;  %v929_v20 = vsel %vm561_vm14, %v925_v37, %v927_v23  ;;  %v1035_v37 = vsel %vm311_vm7, %v3114_v59, %v3091_v18 }
 0x1ee   :  { %v784_v61 = vpop.permute.xlu1 %783 }
 0x1f0   :  { %v1398_v39 = vpop.permute.xlu0 %1397 }
 0x1f1   :  { %v3217_v31 = vsel %vm311_vm7, %v1396_v17, %v1398_v39  ;;  %v3221_v28 = vsel %vm311_vm7, %v1398_v39, %v3201_v22  ;;  %v805_v17 = vmul.f32 %v3541_v35, %v3543_v38 }
 0x1f2   :  { %v788_v26 = vpop.permute.xlu1 %787 }
 0x1f3   :  { %v832_v29 = vadd.f32 %v3011_v0, %v805_v17  ;;  %v901_v0 = vsel %vm533_vm13, %v3144_v25, %v3118_v16 }
 0x1f4   :  { %v1552_v8 = vpop.permute.xlu0 %1551 }
 0x1f5   :  { %v3224_v51 = vsel %vm334_vm8, %v1552_v8, %v1554_v52  ;;  %v859_v39 = vadd.f32 %v3087_v36, %v832_v29 }
 0x1f6   :  { %v604_v53 = vpop.permute.xlu1 %603 }
 0x1f8   :  { %v3226_v13 = vpop.permute.xlu0 %1555 }
 0x1f9   :  { %3542 = vst [vmem:[#allocation17_spill] sm:$0xff] %v3226_v13  ;;  %v3230_v21 = vsel %vm334_vm8, %v1554_v52, %v3226_v13  ;;  %v853_v52 = vsel %vm311_vm7, %v3058_v12, %v3087_v36  ;;  %v902_v12 = vsel %vm533_vm13, %v3118_v16, %v3154_v1  ;;  %v881_v36 = vadd.f32 %v3082_v9, %v859_v39 }
 0x1fa   :  { %v954_v24 = vpop.permute.xlu1 %953  ;;  %v1008_v9 = vsel %vm334_vm8, %v3066_v10, %v3097_v48  ;;  %v986_v16 = vmul.f32 %v3063_v54, %v3540_v14 }
 0x1fc   :  { %v602_v5 = vpop.permute.xlu0 %601 }
 0x1fd   :  { %v3238_v7 = vsel %vm421_vm11, %v602_v5, %v604_v53 }
 0x1fe   :  { %3544 = vst [vmem:[#allocation16_spill] sm:$0xff] %v3238_v7  ;;  %v1108_v13 = vpop.permute.xlu1 %1107  ;;  %v858_v7 = vadd.f32 %v853_v52, %v831_v30  ;;  %v908_v52 = vadd.f32 %v902_v12, %v881_v36  ;;  %v1013_v30 = vadd.f32 %v1008_v9, %v986_v16  ;;  %v987_v16 = vmul.f32 %v3063_v54, %v2927_v2 }
 0x200   :  { %v606_v8 = vpop.permute.xlu0 %605  ;;  %v880_v35 = vadd.f32 %v875_v62, %v858_v7  ;;  %v935_v63 = vadd.f32 %v929_v20, %v908_v52  ;;  %v1040_v10 = vadd.f32 %v1035_v37, %v1013_v30  ;;  %v988_v20 = vmul.f32 %v3063_v54, %v3543_v38 }
 0x201   :  { %v3251_v5 = vsel %vm421_vm11, %v604_v53, %v606_v8  ;;  %v1009_v52 = vsel %vm334_vm8, %v3097_v48, %v3074_v41  ;;  %v1084_v54 = vsel %vm533_vm13, %v3199_v33, %v3184_v56 }
 0x202   :  { %v3263_v53 = vpop.permute.xlu1 %1261  ;;  %v907_v29 = vadd.f32 %v901_v0, %v880_v35  ;;  %v1062_v12 = vadd.f32 %v3128_v6, %v1040_v10 }
 0x204   :  { %v786_v17 = vpop.permute.xlu0 %785  ;;  %v934_v1 = vadd.f32 %v928_v45, %v907_v29 }
 0x205   :  { %v3266_v3 = vsel %vm421_vm11, %v784_v61, %v786_v17  ;;  %v3269_v25 = vsel %vm421_vm11, %v786_v17, %v788_v26 }
 0x206   :  { %v3279_v61 = vpop.permute.xlu1 %1265 }
 0x208   :  { %v952_v23 = vpop.permute.xlu0 %951 }
 0x209   :  { %v955_v26 = vsel %vm589_vm15, %v950_v32, %v952_v23  ;;  %v956_v7 = vsel %vm589_vm15, %v952_v23, %v954_v24  ;;  %v1089_v32 = vadd.f32 %v3199_v33, %v1062_v12  ;;  %v1014_v23 = vadd.f32 %v1009_v52, %v987_v16 }
 0x20a   :  { %v961_v39 = vadd.f32 %v955_v26, %v934_v1  ;;  %v962_v8 = vadd.f32 %v956_v7, %v935_v63  ;;  %v3285_v0 = vpop.permute.xlu1 %1422  ;;  %v1036_v1 = vsel %vm311_vm7, %v3091_v18, %v3124_v11  ;;  %v1015_v63 = vadd.f32 %v3074_v41, %v988_v20 }
 0x20b   :  { %v1058_v26 = vsel %vm288_vm12, %v3128_v6, %v3164_v57  ;;  %v1041_v30 = vadd.f32 %v1036_v1, %v1014_v23  ;;  %v1085_v18 = vsel %vm533_vm13, %v3184_v56, %v3204_v44  ;;  %v1169_v1 = vmul.f32 %v3042_v49, %v3540_v14 }
 0x20c   :  { %970 = vrot.lane.b32.xlu0 %v962_v8, %s2162_s17  ;;  %968 = vrot.lane.b32.xlu1 %v961_v39, %s2162_s17  ;;  %v1106_v62 = vpop.permute.xlu0 %1105  ;;  %v1042_v48 = vadd.f32 %v3124_v11, %v1015_v63  ;;  %v1170_v63 = vmul.f32 %v3042_v49, %v2927_v2  ;;  %v1218_v23 = vsel %vm311_vm7, %v3138_v40, %v3174_v19 }
 0x20d   :  { %v1116_v36 = vadd.f32 %v1106_v62, %v1089_v32  ;;  %v1063_v41 = vadd.f32 %v1058_v26, %v1041_v30  ;;  %v1111_v10 = vsel %vm561_vm14, %v1106_v62, %v1108_v13  ;;  %v1352_v40 = vmul.f32 %v3071_v43, %v3540_v14 }
 0x20e   :  { %v3288_v35 = vpop.permute.xlu1 %1580  ;;  %v1064_v39 = vadd.f32 %v3164_v57, %v1042_v48 }
 0x20f   :  { %v1090_v11 = vadd.f32 %v1084_v54, %v1063_v41  ;;  %v1374_v54 = vsel %vm334_vm8, %v3182_v34, %v3158_v58  ;;  %v1171_v41 = vmul.f32 %v3042_v49, %v3543_v38 }
 0x210   :  { %v1110_v59 = vpop.permute.xlu0 %1109  ;;  %v1091_v32 = vadd.f32 %v1085_v18, %v1064_v39 }
 0x211   :  { %v1112_v6 = vsel %vm561_vm14, %v1108_v13, %v1110_v59  ;;  %v1191_v59 = vsel %vm334_vm8, %v3100_v46, %v3134_v4  ;;  %v1219_v46 = vsel %vm311_vm7, %v3174_v19, %v3148_v27 }
 0x212   :  { %v1133_v17 = vpop.permute.xlu1 %1132  ;;  %v1196_v26 = vadd.f32 %v1191_v59, %v1169_v1 }
 0x213   :  { %v1143_v45 = vadd.f32 %v1133_v17, %v1116_v36  ;;  %v1117_v36 = vadd.f32 %v1111_v10, %v1090_v11  ;;  %v1379_v11 = vadd.f32 %v1374_v54, %v1352_v40  ;;  %v1353_v54 = vmul.f32 %v3071_v43, %v2927_v2 }
 0x214   :  { %v3291_v24 = vpop.permute.xlu0 %1263 }
 0x215   :  { %1149 = vrot.lane.b32.xlu1 %v1143_v45, %s2162_s17  ;;  %v1118_v45 = vadd.f32 %v1112_v6, %v1091_v32  ;;  %v1267_v19 = vsel %vm533_vm13, %v3263_v53, %v3291_v24  ;;  %v1198_v6 = vadd.f32 %v3109_v47, %v1171_v41 }
 0x216   :  { %v1137_v9 = vpop.permute.xlu1 %1136 }
 0x218   :  { %v3296_v29 = vpop.permute.xlu0 %1420 }
 0x219   :  { %v1424_v40 = vsel %vm288_vm12, %v3296_v29, %v3285_v0 }
 0x21a   :  { %v1291_v7 = vpop.permute.xlu1 %1290 }
 0x21c   :  { %v3307_v37 = vpop.permute.xlu0 %1578 }
 0x21e   :  { %v3324_v12 = vpop.permute.xlu1 %1444 }
 0x220   :  { %v3320_v8 = vpop.permute.xlu0 %1582 }
 0x222   :  { %v3326_v20 = vpop.permute.xlu1 %1448 }
 0x224   :  { %v1135_v33 = vpop.permute.xlu0 %1134 }
 0x225   :  { %v1138_v56 = vsel %vm589_vm15, %v1133_v17, %v1135_v33  ;;  %v1139_v44 = vsel %vm589_vm15, %v1135_v33, %v1137_v9  ;;  %v1192_v17 = vsel %vm334_vm8, %v3134_v4, %v3109_v47  ;;  %v1223_v4 = vadd.f32 %v1218_v23, %v1196_v26 }
 0x226   :  { %v1144_v57 = vadd.f32 %v1138_v56, %v1117_v36  ;;  %v1145_v52 = vadd.f32 %v1139_v44, %v1118_v45  ;;  %v3332_v62 = vpop.permute.xlu1 %1605  ;;  %v1197_v30 = vadd.f32 %v1192_v17, %v1170_v63  ;;  %v1225_v33 = vadd.f32 %v3148_v27, %v1198_v6 }
 0x227   :  { %v1245_v10 = vadd.f32 %v3189_v55, %v1223_v4  ;;  %v1406_v55 = vadd.f32 %v3217_v31, %v1379_v11  ;;  %v1268_v44 = vsel %vm533_vm13, %v3291_v24, %v3279_v61  ;;  %v1354_v4 = vmul.f32 %v3071_v43, %v3543_v38 }
 0x228   :  { %1153 = vrot.lane.b32.xlu1 %v1145_v52, %s2162_s17  ;;  %1151 = vrot.lane.b32.xlu0 %v1144_v57, %s2162_s17  ;;  %v1289_v13 = vpop.permute.xlu0 %1288  ;;  %v1224_v39 = vadd.f32 %v1219_v46, %v1197_v30  ;;  %v1247_v57 = vadd.f32 %v3208_v50, %v1225_v33  ;;  %v1375_v30 = vsel %vm334_vm8, %v3158_v58, %v3187_v42 }
 0x229   :  { %v1272_v36 = vadd.f32 %v3263_v53, %v1245_v10  ;;  %v1294_v49 = vsel %vm561_vm14, %v1289_v13, %v1291_v7  ;;  %v1380_v41 = vadd.f32 %v1375_v30, %v1353_v54  ;;  %v1535_v58 = vmul.f32 %v3050_v60, %v3540_v14 }
 0x22a   :  { %v1318_v9 = vpop.permute.xlu1 %1317  ;;  %v1246_v34 = vadd.f32 %v3213_v15, %v1224_v39  ;;  %v1428_v15 = vadd.f32 %v3296_v29, %v1406_v55  ;;  %v1274_v31 = vadd.f32 %v1268_v44, %v1247_v57  ;;  %v1584_v29 = vsel %vm311_vm7, %v3307_v37, %v3288_v35 }
 0x22b   :  { %v1299_v47 = vadd.f32 %v1289_v13, %v1272_v36  ;;  %v1585_v57 = vsel %vm311_vm7, %v3288_v35, %v3320_v8 }
 0x22c   :  { %v1293_v16 = vpop.permute.xlu0 %1292  ;;  %v1273_v56 = vadd.f32 %v1267_v19, %v1246_v34  ;;  %v1455_v63 = vadd.f32 %v3324_v12, %v1428_v15  ;;  %v1407_v19 = vadd.f32 %v3221_v28, %v1380_v41  ;;  %v1562_v28 = vadd.f32 %v3224_v51, %v1535_v58 }
 0x22d   :  { %v1295_v53 = vsel %vm561_vm14, %v1291_v7, %v1293_v16  ;;  %v1536_v51 = vmul.f32 %v3050_v60, %v2927_v2 }
 0x22e   :  { %v1472_v18 = vpop.permute.xlu1 %1471  ;;  %v1300_v52 = vadd.f32 %v1294_v49, %v1273_v56  ;;  %v1301_v61 = vadd.f32 %v1295_v53, %v1274_v31  ;;  %v1429_v34 = vadd.f32 %v1424_v40, %v1407_v19 }
 0x22f   :  { %v1482_v24 = vadd.f32 %v1472_v18, %v1455_v63 }
 0x230   :  { %v1447_v48 = vpop.permute.xlu0 %1446 }
 0x231   :  { %v1450_v11 = vsel %vm533_vm13, %v3324_v12, %v1447_v48  ;;  %v1451_v43 = vsel %vm533_vm13, %v1447_v48, %v3326_v20  ;;  %v1589_v12 = vadd.f32 %v1584_v29, %v1562_v28 }
 0x232   :  { %v1476_v45 = vpop.permute.xlu1 %1475  ;;  %v1456_v49 = vadd.f32 %v1450_v11, %v1429_v34 }
 0x234   :  { %v3363_v32 = vpop.permute.xlu0 %1603 }
 0x235   :  { %v1607_v2 = vsel %vm288_vm12, %v3363_v32, %v3332_v62 }
 0x236   :  { %v3375_v1 = vpop.permute.xlu1 %1629 }
 0x238   :  { %v1316_v59 = vpop.permute.xlu0 %1315 }
 0x239   :  { %v1321_v27 = vsel %vm589_vm15, %v1316_v59, %v1318_v9  ;;  %v1326_v17 = vadd.f32 %v1316_v59, %v1299_v47  ;;  %v3545_v59 = vld [vmem:[#allocation17_spill] sm:$0xff] }
 0x23a   :  { %v1327_v23 = vadd.f32 %v1321_v27, %v1300_v52  ;;  %v1499_v13 = vpop.permute.xlu1 %1498  ;;  %v1563_v52 = vadd.f32 %v3230_v21, %v1536_v51 }
 0x23b   :  { %1332 = vrot.lane.b32.xlu0 %v1326_v17, %s2162_s17  ;;  %v1509_v7 = vadd.f32 %v1499_v13, %v1482_v24 }
 0x23c   :  { %1334 = vrot.lane.b32.xlu1 %v1327_v23, %s2162_s17  ;;  %v1320_v50 = vpop.permute.xlu0 %1319 }
 0x23d   :  { %v1322_v26 = vsel %vm589_vm15, %v1318_v9, %v1320_v50  ;;  %v1381_v9 = vadd.f32 %v3187_v42, %v1354_v4  ;;  %v2168_v4 = vmov 0.0  }
 0x23e   :  { %v1328_v16 = vadd.f32 %v1322_v26, %v1301_v61  ;;  %v1503_v6 = vpop.permute.xlu1 %1502 }
 0x23f   :  { %v1408_v10 = vadd.f32 %v3201_v22, %v1381_v9 }
 0x240   :  { %1515 = vrot.lane.b32.xlu1 %v1509_v7, %s2162_s17  ;;  %1336 = vrot.lane.b32.xlu0 %v1328_v16, %s2162_s17  ;;  %v1474_v46 = vpop.permute.xlu0 %1473 }
 0x241   :  { %v1430_v42 = vadd.f32 %v3285_v0, %v1408_v10  ;;  %v1477_v36 = vsel %vm561_vm14, %v1472_v18, %v1474_v46  ;;  %v1478_v14 = vsel %vm561_vm14, %v1474_v46, %v1476_v45  ;;  %v1611_v0 = vadd.f32 %v3363_v32, %v1589_v12 }
 0x242   :  { %v1483_v55 = vadd.f32 %v1477_v36, %v1456_v49  ;;  %v1657_v20 = vpop.permute.xlu1 %1656  ;;  %v1537_v18 = vmul.f32 %v3050_v60, %v3543_v38  ;;  %v1590_v38 = vadd.f32 %v1585_v57, %v1563_v52 }
 0x243   :  { %v1457_v33 = vadd.f32 %v1451_v43, %v1430_v42 }
 0x244   :  { %v1628_v39 = vpop.permute.xlu0 %1627  ;;  %v1564_v53 = vadd.f32 %v3545_v59, %v1537_v18  ;;  %v1612_v61 = vadd.f32 %v1607_v2, %v1590_v38 }
 0x245   :  { %v1484_v56 = vadd.f32 %v1478_v14, %v1457_v33  ;;  %v1638_v15 = vadd.f32 %v1628_v39, %v1611_v0  ;;  %v1633_v35 = vsel %vm533_vm13, %v1628_v39, %v3375_v1 }
 0x246   :  { %v1591_v17 = vadd.f32 %v3320_v8, %v1564_v53  ;;  %v1682_v31 = vpop.permute.xlu1 %1681 }
 0x248   :  { %v1632_v22 = vpop.permute.xlu0 %1631  ;;  %v1613_v23 = vadd.f32 %v3332_v62, %v1591_v17 }
 0x249   :  { %v1634_v21 = vsel %vm533_vm13, %v3375_v1, %v1632_v22 }
 0x24a   :  { %v1640_v8 = vadd.f32 %v1634_v21, %v1613_v23  ;;  %v1686_v26 = vpop.permute.xlu1 %1685 }
 0x24c   :  { %v1501_v48 = vpop.permute.xlu0 %1500 }
 0x24d   :  { %v1504_v44 = vsel %vm589_vm15, %v1499_v13, %v1501_v48  ;;  %v1505_v37 = vsel %vm589_vm15, %v1501_v48, %v1503_v6  ;;  %v1639_v13 = vadd.f32 %v1633_v35, %v1612_v61 }
 0x24e   :  { %v1510_v45 = vadd.f32 %v1504_v44, %v1483_v55  ;;  %v1511_v47 = vadd.f32 %v1505_v37, %v1484_v56 }
 0x250   :  { %1519 = vrot.lane.b32.xlu1 %v1511_v47, %s2162_s17  ;;  %1517 = vrot.lane.b32.xlu0 %v1510_v45, %s2162_s17  ;;  %v1655_v27 = vpop.permute.xlu0 %1654 }
 0x251   :  { %v1665_v60 = vadd.f32 %v1655_v27, %v1638_v15  ;;  %v1660_v50 = vsel %vm561_vm14, %v1655_v27, %v1657_v20 }
 0x252   :  { %v1666_v7 = vadd.f32 %v1660_v50, %v1639_v13 }
 0x253   :  { %v1692_v63 = vadd.f32 %v1682_v31, %v1665_v60  ;;  %v3546_v60 = vld [vmem:[#allocation16_spill] sm:$0xff] }
 0x254   :  { %v1659_v24 = vpop.permute.xlu0 %1658 }
 0x255   :  { %v1661_v32 = vsel %vm561_vm14, %v1657_v20, %v1659_v24  ;;  %1698 = vrot.lane.b32.xlu0 %v1692_v63, %s2162_s17 }
 0x256   :  { %v1667_v16 = vadd.f32 %v1661_v32, %v1640_v8 }
 0x258   :  { %v1684_v46 = vpop.permute.xlu0 %1683 }
 0x259   :  { %v1687_v30 = vsel %vm589_vm15, %v1682_v31, %v1684_v46  ;;  %v1688_v1 = vsel %vm589_vm15, %v1684_v46, %v1686_v26 }
 0x25a   :  { %v1693_v54 = vadd.f32 %v1687_v30, %v1666_v7  ;;  %v1694_v62 = vadd.f32 %v1688_v1, %v1667_v16 }
 0x25c   :  { %1702 = vrot.lane.b32.xlu0 %v1694_v62, %s2162_s17  ;;  %1700 = vrot.lane.b32.xlu1 %v1693_v54, %s2162_s17  ;;  %s2172_s17 = smov 48  }
 0x25f   :  { %v967_v41 = vpop.permute.xlu0 %966 }
 0x260   :  { %1727 = vrot.lane.b32.xlu0 %v3269_v25, %s2167_s3  ;;  %1725 = vrot.lane.b32.xlu1 %v3266_v3, %s2167_s3 }
 0x264   :  { %1723 = vrot.lane.b32.xlu1 %v2168_v4, %s2167_s3  ;;  %1744 = vrot.lane.b32.xlu0 %v2168_v4, %s2169_s6 }
 0x27e   :  { %v969_v9 = vpop.permute.xlu1 %968  ;;  %v971_v39 = vpop.permute.xlu0 %970 }
 0x27f   :  { %v972_v40 = vsel %vm421_vm11, %v967_v41, %v969_v9  ;;  %v973_v10 = vsel %vm421_vm11, %v969_v9, %v971_v39 }
 0x280   :  { %1746 = vrot.lane.b32.xlu1 %v972_v40, %s2169_s6  ;;  %1748 = vrot.lane.b32.xlu0 %v973_v10, %s2169_s6 }
 0x287   :  { %v1150_v19 = vpop.permute.xlu1 %1149 }
 0x29a   :  { %v1154_v6 = vpop.permute.xlu1 %1153  ;;  %v1152_v58 = vpop.permute.xlu0 %1151 }
 0x29b   :  { %v1155_v25 = vsel %vm421_vm11, %v1150_v19, %v1152_v58  ;;  %v1156_v3 = vsel %vm421_vm11, %v1152_v58, %v1154_v6  ;;  %v1851_v19 = vstv %s1850_s15 }
 0x29c   :  { %1765 = vrot.lane.b32.xlu0 %v1156_v3, %s2170_s7  ;;  %1763 = vrot.lane.b32.xlu1 %v1155_v25, %s2170_s7 }
 0x2ad   :  { %v1333_v11 = vpop.permute.xlu0 %1332 }
 0x2ae   :  { %v1335_v43 = vpop.permute.xlu1 %1334 }
 0x2af   :  { %v1338_v42 = vsel %vm421_vm11, %v1333_v11, %v1335_v43  ;;  %v1856_v11 = vstv %s2073_s16 }
 0x2b0   :  { %1781 = vrot.lane.b32.xlu1 %v1338_v42, %s2171_s10 }
 0x2b2   :  { %v1337_v34 = vpop.permute.xlu0 %1336  ;;  %v1516_v22 = vpop.permute.xlu1 %1515 }
 0x2b3   :  { %v1339_v29 = vsel %vm421_vm11, %v1335_v43, %v1337_v34 }
 0x2b4   :  { %1785 = vrot.lane.b32.xlu1 %v2168_v4, %s2171_s10  ;;  %1783 = vrot.lane.b32.xlu0 %v1339_v29, %s2171_s10 }
 0x2c2   :  { %v1520_v28 = vpop.permute.xlu1 %1519  ;;  %v1518_v36 = vpop.permute.xlu0 %1517 }
 0x2c3   :  { %v1521_v14 = vsel %vm421_vm11, %v1516_v22, %v1518_v36  ;;  %v1522_v49 = vsel %vm421_vm11, %v1518_v36, %v1520_v28 }
 0x2c4   :  { %1804 = vrot.lane.b32.xlu1 %v1522_v49, %s2172_s17  ;;  %1802 = vrot.lane.b32.xlu0 %v1521_v14, %s2172_s17 }
 0x2c7   :  { %v1699_v33 = vpop.permute.xlu0 %1698 }
 0x2c8   :  { %1806 = vrot.lane.b32.xlu0 %v2168_v4, %s2172_s17 }
 0x2ce   :  { %v1701_v12 = vpop.permute.xlu1 %1700  ;;  %v1703_v55 = vpop.permute.xlu0 %1702 }
 0x2cf   :  { %v1704_v56 = vsel %vm421_vm11, %v1699_v33, %v1701_v12  ;;  %v1705_v20 = vsel %vm421_vm11, %v1701_v12, %v1703_v55 }
 0x2d0   :  { %1823 = vrot.lane.b32.xlu1 %v1704_v56, %s2173_s14  ;;  %1825 = vrot.lane.b32.xlu0 %v1705_v20, %s2173_s14 }
 0x2d2   :  { %v1726_v48 = vpop.permute.xlu1 %1725  ;;  %v1728_v0 = vpop.permute.xlu0 %1727 }
 0x2d3   :  { %v1731_v52 = vsel %vm1729_vm1, %v1726_v48, %v1728_v0  ;;  %v1737_v24 = vadd.f32 %v1728_v0, %v3251_v5 }
 0x2d4   :  { %1827 = vrot.lane.b32.xlu1 %v2168_v4, %s2173_s14  ;;  %v1736_v38 = vadd.f32 %v1731_v52, %v3546_v60 }
 0x2d6   :  { %v1724_v44 = vpop.permute.xlu1 %1723  ;;  %v1745_v37 = vpop.permute.xlu0 %1744 }
 0x2d7   :  { %v1730_v17 = vsel %vm1729_vm1, %v1724_v44, %v1726_v48 }
 0x2f2   :  { %v1747_v51 = vpop.permute.xlu1 %1746  ;;  %v1749_v18 = vpop.permute.xlu0 %1748 }
 0x2f3   :  { %v1751_v59 = vsel %vm1750_vm2, %v1745_v37, %v1747_v51  ;;  %v1752_v2 = vsel %vm1750_vm2, %v1747_v51, %v1749_v18  ;;  %v1758_v26 = vadd.f32 %v1749_v18, %v1737_v24 }
 0x2f4   :  { %v1756_v31 = vadd.f32 %v1751_v59, %v1730_v17  ;;  %v1757_v21 = vadd.f32 %v1752_v2, %v1736_v38 }
 0x30e   :  { %v1764_v45 = vpop.permute.xlu1 %1763  ;;  %v1766_v47 = vpop.permute.xlu0 %1765 }
 0x30f   :  { %v1768_v35 = vsel %vm1767_vm3, %v1764_v45, %v1766_v47  ;;  %v1772_v23 = vadd.f32 %v1764_v45, %v1756_v31  ;;  %v1774_v30 = vadd.f32 %v1766_v47, %v1758_v26 }
 0x310   :  { %v1773_v50 = vadd.f32 %v1768_v35, %v1757_v21 }
 0x322   :  { %v1782_v57 = vpop.permute.xlu1 %1781 }
 0x323   :  { %v1793_v13 = vadd.f32 %v1782_v57, %v1772_v23 }
 0x326   :  { %v1784_v15 = vpop.permute.xlu0 %1783  ;;  %v1786_v53 = vpop.permute.xlu1 %1785 }
 0x327   :  { %v1788_v61 = vsel %vm1787_vm4, %v1782_v57, %v1784_v15  ;;  %v1789_v16 = vsel %vm1787_vm4, %v1784_v15, %v1786_v53  ;;  %v3547_v57 = vld [vmem:[#allocation10_spill] sm:$0xff] }
 0x328   :  { %v1794_v7 = vadd.f32 %v1788_v61, %v1773_v50  ;;  %v1795_v9 = vadd.f32 %v1789_v16, %v1774_v30  ;;  %v1883_v15 = vsub.s32 2, %v3547_v57  ;;  %v1949_v52 = vsub.s32 3, %v3547_v57 }
 0x336   :  { %v1803_v27 = vpop.permute.xlu0 %1802  ;;  %v1805_v63 = vpop.permute.xlu1 %1804 }
 0x337   :  { %v1809_v8 = vsel %vm1808_vm5, %v1803_v27, %v1805_v63  ;;  %v1814_v46 = vadd.f32 %v1803_v27, %v1793_v13 }
 0x338   :  { %v1815_v1 = vadd.f32 %v1809_v8, %v1794_v7 }
 0x33a   :  { %v1807_v32 = vpop.permute.xlu0 %1806 }
 0x33b   :  { %v1810_v4 = vsel %vm1808_vm5, %v1805_v63, %v1807_v32  ;;  %v3548_v32 = vld [vmem:[#allocation11_spill] sm:$0xff] }
 0x33c   :  { %v1816_v10 = vadd.f32 %v1810_v4, %v1795_v9 }
 0x342   :  { %v1824_v54 = vpop.permute.xlu1 %1823  ;;  %v1826_v62 = vpop.permute.xlu0 %1825 }
 0x343   :  { %v1835_v5 = vadd.f32 %v1824_v54, %v1814_v46  ;;  %v1830_v41 = vsel %vm1829_vm6, %v1824_v54, %v1826_v62  ;;  %v3549_v46 = vld [vmem:[#allocation12_spill] sm:$0xff] }
 0x344   :  { %v1836_v39 = vadd.f32 %v1830_v41, %v1815_v1 }
 0x345   :  { %v1841_v40 = vrot.slane %v1835_v5, 4 }
 0x346   :  { %v1842_v6 = vrot.slane %v1836_v39, 4  ;;  %v1828_v58 = vpop.permute.xlu1 %1827 }
 0x347   :  { %v1847_v25 = vadd.f32 %v1841_v40, %v1835_v5  ;;  %v1831_v3 = vsel %vm1829_vm6, %v1826_v62, %v1828_v58 }
 0x348   :  { %v1848_v43 = vadd.f32 %v1842_v6, %v1836_v39  ;;  %v1837_v42 = vadd.f32 %v1831_v3, %v1816_v10 }
 0x349   :  { %v1852_v34 = vmul.f32 %v1851_v19, %v1847_v25 }
 0x34a   :  { %v1853_v29 = vmul.f32 %v1851_v19, %v1848_v43  ;;  %v1843_v22 = vrot.slane %v1837_v42, 4 }
 0x34b   :  { %v1857_v28 = vadd.f32 %v1856_v11, %v1852_v34 }
 0x34c   :  { %v1858_v36 = vadd.f32 %v1856_v11, %v1853_v29  ;;  %v1849_v14 = vadd.f32 %v1843_v22, %v1837_v42 }
 0x34d   :  { %v1860_v49 = vmax.f32 %v1857_v28, 0.0 }
 0x34e   :  { %v1861_v33 = vmax.f32 %v1858_v36, 0.0  ;;  %v1854_v12 = vmul.f32 %v1851_v19, %v1849_v14 }
 0x34f   :  { %v2074_v55 = vmul.f32 -1.442695, %v1860_v49 }
 0x350   :  { %v2075_v56 = vmul.f32 -1.442695, %v1861_v33  ;;  %v1859_v20 = vadd.f32 %v1856_v11, %v1854_v12  ;;  %v2115_v33 = vld [vmem:[%s3507_s0] sm:$0xff] }
 0x351   :  { %2103 = vpow2.f32 %v2074_v55  ;;  %v3550_v55 = vld [vmem:[#allocation13_spill] sm:$0xff] }
 0x352   :  { %2105 = vpow2.f32 %v2075_v56  ;;  %v1862_v48 = vmax.f32 %v1859_v20, 0.0 }
 0x354   :  { %v2076_v0 = vmul.f32 -1.442695, %v1862_v48 }
 0x356   :  { %2107 = vpow2.f32 %v2076_v0 }
 0x35b   :  { %v2104_v44 = vpop.eup %2103 }
 0x35c   :  { %v2106_v37 = vpop.eup %2105  ;;  %v1872_v51 = vadd.f32 1.0, %v2104_v44 }
 0x35d   :  { %v1873_v18 = vadd.f32 1.0, %v2106_v37  ;;  %v3551_v37 = vld [vmem:[#allocation14_spill] sm:$0xff] }
 0x35e   :  { %2109 = vrcp.f32 %v1872_v51 }
 0x35f   :  { %2111 = vrcp.f32 %v1873_v18  ;;  %v2116_v18 = vld [vmem:[%s3507_s0 + $0x8] sm:$0xff] }
 0x360   :  { %v2108_v45 = vpop.eup %2107 }
 0x361   :  { %v1874_v47 = vadd.f32 1.0, %v2108_v45 }
 0x363   :  { %2113 = vrcp.f32 %v1874_v47 }
 0x368   :  { %v2110_v59 = vpop.eup %2109 }
 0x369   :  { %v2112_v53 = vpop.eup %2111  ;;  %v1884_v27 = vrot.slane %v2110_v59, %v1883_v15  ;;  %v1910_v2 = vrot.slane %v2110_v59, 2  ;;  %v1950_v17 = vrot.slane %v2110_v59, %v1949_v52 }
 0x36a   :  { %v1888_v60 = vrot.slane %v2112_v53, %v1883_v15  ;;  %v1911_v38 = vrot.slane %v2112_v53, 2  ;;  %v1954_v35 = vrot.slane %v2112_v53, %v1949_v52 }
 0x36b   :  { %v1916_v21 = vsub.f32 %v2110_v59, %v1910_v2 }
 0x36c   :  { %v1896_v31 = vcombine.low %v1884_v27, %v1888_v60  ;;  %v1917_v63 = vsub.f32 %v2112_v53, %v1911_v38  ;;  %v1962_v50 = vcombine.low %v1950_v17, %v1954_v35 }
 0x36d   :  { %v2114_v23 = vpop.eup %2113  ;;  %v1922_v13 = vrot.slane %v1916_v21, %v3548_v32  ;;  %v1976_v30 = vrot.slane %v1916_v21, %v3549_v46 }
 0x36e   :  { %1897 = vrot.lane.b32.xlu0 %v1896_v31, %s2172_s17  ;;  %v1892_v61 = vrot.slane %v2114_v23, %v1883_v15  ;;  %v1912_v24 = vrot.slane %v2114_v23, 2  ;;  %v1926_v8 = vrot.slane %v1917_v63, %v3548_v32  ;;  %v1958_v26 = vrot.slane %v2114_v23, %v1949_v52 }
 0x36f   :  { %v1980_v1 = vrot.slane %v1917_v63, %v3549_v46 }
 0x370   :  { %1899 = vrot.lane.b32.xlu1 %v1892_v61, %s2172_s17  ;;  %v1918_v7 = vsub.f32 %v2114_v23, %v1912_v24  ;;  %v1934_v16 = vcombine.low %v1922_v13, %v1926_v8 }
 0x371   :  { %v1988_v62 = vcombine.low %v1976_v30, %v1980_v1 }
 0x372   :  { %1963 = vrot.lane.b32.xlu0 %v1962_v50, %s2172_s17  ;;  %v1930_v54 = vrot.slane %v1918_v7, %v3548_v32  ;;  %v1984_v4 = vrot.slane %v1918_v7, %v3549_v46 }
 0x374   :  { %1965 = vrot.lane.b32.xlu1 %v1958_v26, %s2172_s17 }
 0x376   :  { %1935 = vrot.lane.b32.xlu0 %v1934_v16, %s2172_s17 }
 0x378   :  { %1937 = vrot.lane.b32.xlu1 %v1930_v54, %s2172_s17 }
 0x37a   :  { %1989 = vrot.lane.b32.xlu0 %v1988_v62, %s2172_s17 }
 0x37c   :  { %1991 = vrot.lane.b32.xlu1 %v1984_v4, %s2172_s17 }
 0x3e0   :  { %v1898_v5 = vpop.permute.xlu0 %1897 }
 0x3e1   :  { %v1901_v10 = vrot.slane %v1898_v5, 4 }
 0x3e2   :  { %v1900_v41 = vpop.permute.xlu1 %1899 }
 0x3e3   :  { %v1902_v39 = vrot.slane %v1900_v41, 4 }
 0x3e4   :  { %v1964_v9 = vpop.permute.xlu0 %1963 }
 0x3e5   :  { %v1903_v6 = vsel %vm86_vm0, %v1901_v10, %v1902_v39  ;;  %v1967_v3 = vrot.slane %v1964_v9, 4 }
 0x3e6   :  { %v1966_v40 = vpop.permute.xlu1 %1965  ;;  %v1904_v42 = vsel %vm1808_vm5, %v1898_v5, %v1903_v6 }
 0x3e7   :  { %v1968_v58 = vrot.slane %v1966_v40, 4  ;;  %v1906_v12 = vmul.f32 %v2115_v33, %v1904_v42 }
 0x3e8   :  { %v1936_v19 = vpop.permute.xlu0 %1935 }
 0x3e9   :  { %v1939_v11 = vrot.slane %v1936_v19, 4  ;;  %v1969_v29 = vsel %vm86_vm0, %v1967_v3, %v1968_v58 }
 0x3ea   :  { %v1938_v25 = vpop.permute.xlu1 %1937  ;;  %v1970_v20 = vsel %vm1808_vm5, %v1964_v9, %v1969_v29 }
 0x3eb   :  { %v1940_v43 = vrot.slane %v1938_v25, 4  ;;  %v1972_v45 = vmul.f32 %v2116_v18, %v1970_v20 }
 0x3ec   :  { %v1990_v34 = vpop.permute.xlu0 %1989 }
 0x3ed   :  { %v1941_v22 = vsel %vm86_vm0, %v1939_v11, %v1940_v43  ;;  %v1993_v14 = vrot.slane %v1990_v34, 4 }
 0x3ee   :  { %v1942_v28 = vsel %vm1808_vm5, %v1936_v19, %v1941_v22  ;;  %v1992_v36 = vpop.permute.xlu1 %1991 }
 0x3ef   :  { %v1994_v49 = vrot.slane %v1992_v36, 4  ;;  %v1944_v56 = vmul.f32 %v1942_v28, %v3550_v55 }
 0x3f1   :  { %v1995_v48 = vsel %vm86_vm0, %v1993_v14, %v1994_v49  ;;  %v1945_v0 = vadd.f32 %v1944_v56, %v1906_v12 }
 0x3f2   :  { %v1996_v44 = vsel %vm1808_vm5, %v1990_v34, %v1995_v48 }
 0x3f3   :  { %v1998_v51 = vmul.f32 %v1996_v44, %v3551_v37  ;;  %1946 = vst [vmem:[#allocation7] sm:$0xff] %v1945_v0 }
 0x3f5   :  { %v1999_v47 = vadd.f32 %v1998_v51, %v1972_v45 }
 0x3f7   :  { %2001 = vst [vmem:[#allocation7 + $0x8] sm:$0xff] %v1999_v47 }
 0x3f8   :  { %2140 = shalt.err (!%p2137_p9)
}
 0x3f9   :  { %s2141_s22 = scalar_lea.hbm %s3512_s5, 256 }
 0x3fa   :  { %p2142_p10 = scmp.ne.s32.totalorder %s3512_s5, %s2141_s22  ;;  %p2145_p11 = scmp.lt.u32.totalorder %s2141_s22, %s3512_s5 }
 0x3fc   :  { %p2147_p12 = pnand %p2145_p11, %p2142_p10 }
 0x3fe   :  { %2150 = shalt.err (!%p2147_p12)
}
 0x3ff   :  { %s2175_s25 = smov 128   ;;  %s2176_s26 = smov 8  }
 0x400   :  { %2013 = dma.vmem_to_hbm [thread:$0]  %s2008_s13, 256, %s3512_s5, [#allocation5], %s2175_s25, %s2175_s25, %s2176_s26  }
 0x401   :  { %2153 = dma.done.wait [#allocation5], 256  }
 0x402   :  { %2154 = vsyncadd [#allocation5], 4294967040 }
 0x403   :  { %2017 = vsyncpa [#allocation5], 1 }
 0x404   :  { %2018 = vsyncpa [#allocation6], 1 }

</bundles_post_ra>
